<compile_context>
chip_gen: v5e
topology: v5e:2x2
jax: 0.10.0
libtpu: 0.0.40
codegen_flags: <defaults>
</compile_context>

<pallas_src>
import math

import jax
import jax.numpy as jnp
from jax import lax
from jax.experimental import pallas as pl
from jax.experimental.pallas import tpu as pltpu


# ---------------------------------------------------------------- kernel -----

def make_rdb_kernel(C, G, L, Wp, P):
    """Builds the fused RDB kernel for one image (one grid step).

    Refs, in order:
      x_ref    : (1, C, P)    zero-padded input, spatial flattened on lanes
      mask_ref : (1, P)       1.0 on interior (valid) lanes, 0.0 on halo/tail
      per dense layer l: w_ref (9, G, Cin_l), b_ref (G, 1)
      w1_ref   : (C, C+L*G)   1x1 conv weight (cout, cin)
      b1_ref   : (C, 1)
      o_ref    : (1, C, P)    output (padded layout; wrapper slices interior)
      buf      : (C+L*G, P)   VMEM scratch = growing concat buffer
    """

    def kernel(*refs):
        x_ref, mask_ref = refs[0], refs[1]
        dense_refs = refs[2:2 + 2 * L]
        w1_ref, b1_ref = refs[2 + 2 * L], refs[3 + 2 * L]
        o_ref = refs[4 + 2 * L]
        buf = refs[5 + 2 * L]

        mask = mask_ref[...]                      # (1, P), hoisted once
        buf[0:C, :] = x_ref[0]                    # seed concat buffer with x_pad

        cin = C
        for l in range(L):                        # static unroll over dense layers
            w_ref = dense_refs[2 * l]
            b_ref = dense_refs[2 * l + 1]
            x_in = buf[0:cin, :]                  # (cin, P) -- stays in VMEM
            # Bias folded into the accumulator init (no extra broadcast-add).
            acc = jnp.broadcast_to(b_ref[...], (G, P))
            # 3x3 conv = 9 lane-rolled matmuls; output lanes = spatial (dense).
            for k in range(9):
                kh, kw = divmod(k, 3)
                s = (kh - 1) * Wp + (kw - 1)      # flat-index shift of this tap
                shifted = x_in if s == 0 else pltpu.roll(
                    x_in, shift=(-s) % P, axis=1)
                acc = acc + jnp.dot(w_ref[k], shifted,
                                    preferred_element_type=jnp.float32)
            # ReLU, then zero halo/tail lanes so the next layer's taps read
            # proper zero padding.
            buf[cin:cin + G, :] = jnp.maximum(acc, 0.0) * mask
            cin = cin + G

        # 1x1 conv over the full concat + bias + residual (x == buf[0:C]).
        y = jnp.dot(w1_ref[...], buf[...], preferred_element_type=jnp.float32)
        o_ref[0] = y + b1_ref[...] + buf[0:C, :]

    return kernel


# --------------------------------------------------------------- wrapper -----

def rdb_forward(x_nchw, params):
    B, C, H, W = x_nchw.shape
    dense = params["dense"]
    L = len(dense)
    G = dense[0][0].shape[1]
    C_total = C + L * G
    Hp, Wp = H + 2, W + 2
    HpWp = Hp * Wp
    P = ((HpWp + 127) // 128) * 128               # lane-dense (multiple of 128)

    # Zero-pad spatially (conv padding=1), flatten spatial onto lanes, pad lanes.
    xp = jnp.pad(x_nchw, ((0, 0), (0, 0), (1, 1), (1, 1))).reshape(B, C, HpWp)
    xp = jnp.pad(xp, ((0, 0), (0, 0), (0, P - HpWp)))

    # Interior-validity mask in the flattened padded layout (computed once here
    # so the kernel does no vector int div/mod).
    p_idx = jnp.arange(P)
    hp, wp = p_idx // Wp, p_idx % Wp
    mask = ((p_idx < HpWp) & (hp >= 1) & (hp <= H)
            & (wp >= 1) & (wp <= W)).astype(jnp.float32).reshape(1, P)

    w1, b1 = params["conv1x1"]

    in_specs = [
        pl.BlockSpec((1, C, P), lambda b: (b, 0, 0)),     # x, per-image block
        pl.BlockSpec((1, P), lambda b: (0, 0)),           # mask (constant block)
    ]
    flat_params = []
    for (w, bv) in dense:
        cin_l = w.shape[2]
        in_specs.append(pl.BlockSpec((9, G, cin_l), lambda b: (0, 0, 0)))
        in_specs.append(pl.BlockSpec((G, 1), lambda b: (0, 0)))
        flat_params += [w, bv]
    in_specs.append(pl.BlockSpec((C, C_total), lambda b: (0, 0)))
    in_specs.append(pl.BlockSpec((C, 1), lambda b: (0, 0)))
    flat_params += [w1, b1]

    out = pl.pallas_call(
        make_rdb_kernel(C, G, L, Wp, P),
        out_shape=jax.ShapeDtypeStruct((B, C, P), jnp.float32),
        grid=(B,),
        in_specs=in_specs,
        out_specs=pl.BlockSpec((1, C, P), lambda b: (b, 0, 0)),
        scratch_shapes=[pltpu.VMEM((C_total, P), jnp.float32)],
        compiler_params=pltpu.CompilerParams(
            dimension_semantics=("parallel",),   # images split across TCs (v7x)
            vmem_limit_bytes=32 * 1024 * 1024),
    )(xp, mask, *flat_params)

    # Drop lane padding + conv halo -> NCHW output directly (channel-major kept
    # throughout, so no NHWC transposes are needed).
    out = out[:, :, :HpWp].reshape(B, C, Hp, Wp)[:, :, 1:1 + H, 1:1 + W]
    return out


# ---------------------------------------------------------- params / init ----

def init_rdb_params(key, in_channels, num_dense_layer, growth_rate):
    """Deterministic synthetic init (PyTorch-style uniform(-1/sqrt(fan_in))).

    Dense layer l weight stored as (9, G, Cin_l) with w[kh*3+kw, g, c] =
    conv.weight[g, c, kh, kw]; biases stored as column vectors (broadcast on
    lanes inside the kernel). 1x1 conv stored as (C_out, C_in).
    """
    params = {"dense": []}
    cin = in_channels
    for _ in range(num_dense_layer):
        key, k1, k2 = jax.random.split(key, 3)
        bound = 1.0 / math.sqrt(cin * 9)
        w = jax.random.uniform(k1, (9, growth_rate, cin), jnp.float32,
                               -bound, bound)
        b = jax.random.uniform(k2, (growth_rate, 1), jnp.float32, -bound, bound)
        params["dense"].append((w, b))
        cin += growth_rate
    key, k1, k2 = jax.random.split(key, 3)
    bound = 1.0 / math.sqrt(cin)
    w1 = jax.random.uniform(k1, (in_channels, cin), jnp.float32, -bound, bound)
    b1 = jax.random.uniform(k2, (in_channels, 1), jnp.float32, -bound, bound)
    params["conv1x1"] = (w1, b1)
    return params


# ----------------------------------------------------------- pure-JAX ref ----

def rdb_reference(x_nchw, params):
    x = jnp.transpose(x_nchw, (0, 2, 3, 1))       # NHWC
    out = x
    for (w, b) in params["dense"]:
        g, cin = w.shape[1], w.shape[2]
        w_hwio = jnp.transpose(w.reshape(3, 3, g, cin), (0, 1, 3, 2))
        y = lax.conv_general_dilated(
            out, w_hwio, (1, 1), "SAME",
            dimension_numbers=("NHWC", "HWIO", "NHWC")) + b.reshape(1, 1, 1, g)
        y = jnp.maximum(y, 0.0)
        out = jnp.concatenate([out, y], axis=-1)  # torch.cat((x, out), 1)
    w1, b1 = params["conv1x1"]
    y = jnp.einsum("bhwc,dc->bhwd", out, w1) + b1.reshape(1, 1, 1, -1)
    return jnp.transpose(y + x, (0, 3, 1, 2))


# -------------------------------------------------------------------- main ---

if __name__ == "__main__":
    B, C, H, W = 2, 4, 16, 16                     # in_channels=4
    num_dense_layer, growth_rate = 3, 4

    key = jax.random.PRNGKey(0)
    key, kx, kp = jax.random.split(key, 3)
    x = jax.random.normal(kx, (B, C, H, W), jnp.float32)
    params = init_rdb_params(kp, C, num_dense_layer, growth_rate)

    out = jax.block_until_ready(rdb_forward(x, params))
    ref = jax.block_until_ready(rdb_reference(x, params))

    assert out.shape == (B, C, H, W)
    err = float(jnp.max(jnp.abs(out - ref)))
    assert jnp.allclose(out, ref, atol=1e-4, rtol=1e-4), err
    print("KERNEL_OK")
</pallas_src>

<mosaic_0001>
module attributes {stable_mosaic.version = 11 : i64} {
  func.func @kernel(%arg0: i32, %arg1: memref<1x4x384xf32, #tpu.memory_space<vmem>>, %arg2: memref<1x384xf32, #tpu.memory_space<vmem>>, %arg3: memref<9x4x4xf32, #tpu.memory_space<vmem>>, %arg4: memref<4x1xf32, #tpu.memory_space<vmem>>, %arg5: memref<9x4x8xf32, #tpu.memory_space<vmem>>, %arg6: memref<4x1xf32, #tpu.memory_space<vmem>>, %arg7: memref<9x4x12xf32, #tpu.memory_space<vmem>>, %arg8: memref<4x1xf32, #tpu.memory_space<vmem>>, %arg9: memref<4x16xf32, #tpu.memory_space<vmem>>, %arg10: memref<4x1xf32, #tpu.memory_space<vmem>>, %arg11: memref<1x4x384xf32, #tpu.memory_space<vmem>>, %arg12: memref<16x384xf32, #tpu.memory_space<vmem>>) attributes {dimension_semantics = [#tpu.dimension_semantics<parallel>], iteration_bounds = array<i64: 2>, scalar_prefetch = 0 : i64, scratch_operands = 1 : i64, tpu.core_type = #tpu.core_type<tc>, window_params = [{transform_indices = @transform_0, window_bounds = array<i64: 1, 4, 384>}, {pipeline_mode = #tpu.pipeline_mode<synchronous>, transform_indices = @transform_1, window_bounds = array<i64: 1, 384>}, {pipeline_mode = #tpu.pipeline_mode<synchronous>, transform_indices = @transform_2, window_bounds = array<i64: 9, 4, 4>}, {pipeline_mode = #tpu.pipeline_mode<synchronous>, transform_indices = @transform_3, window_bounds = array<i64: 4, 1>}, {pipeline_mode = #tpu.pipeline_mode<synchronous>, transform_indices = @transform_4, window_bounds = array<i64: 9, 4, 8>}, {pipeline_mode = #tpu.pipeline_mode<synchronous>, transform_indices = @transform_5, window_bounds = array<i64: 4, 1>}, {pipeline_mode = #tpu.pipeline_mode<synchronous>, transform_indices = @transform_6, window_bounds = array<i64: 9, 4, 12>}, {pipeline_mode = #tpu.pipeline_mode<synchronous>, transform_indices = @transform_7, window_bounds = array<i64: 4, 1>}, {pipeline_mode = #tpu.pipeline_mode<synchronous>, transform_indices = @transform_8, window_bounds = array<i64: 4, 16>}, {pipeline_mode = #tpu.pipeline_mode<synchronous>, transform_indices = @transform_9, window_bounds = array<i64: 4, 1>}, {transform_indices = @transform_10, window_bounds = array<i64: 1, 4, 384>}]} {
    %c0 = arith.constant 0 : index
    %c0_0 = arith.constant 0 : index
    %0 = vector.load %arg2[%c0, %c0_0] : memref<1x384xf32, #tpu.memory_space<vmem>>, vector<1x384xf32>
    %c0_1 = arith.constant 0 : index
    %c0_2 = arith.constant 0 : index
    %c0_3 = arith.constant 0 : index
    %1 = vector.load %arg1[%c0_1, %c0_2, %c0_3] : memref<1x4x384xf32, #tpu.memory_space<vmem>>, vector<1x4x384xf32>
    %2 = vector.shape_cast %1 : vector<1x4x384xf32> to vector<4x384xf32>
    %c0_4 = arith.constant 0 : index
    %c0_5 = arith.constant 0 : index
    %3 = vector.load %arg12[%c0_4, %c0_5] : memref<16x384xf32, #tpu.memory_space<vmem>>, vector<4x384xf32>
    tpu.vector_store %arg12[%c0_4, %c0_5], %2 {strides = array<i32>} : memref<16x384xf32, #tpu.memory_space<vmem>>, vector<4x384xf32>,
    %c0_6 = arith.constant 0 : index
    %c0_7 = arith.constant 0 : index
    %4 = vector.load %arg12[%c0_6, %c0_7] : memref<16x384xf32, #tpu.memory_space<vmem>>, vector<4x384xf32>
    %c0_8 = arith.constant 0 : index
    %c0_9 = arith.constant 0 : index
    %5 = vector.load %arg4[%c0_8, %c0_9] : memref<4x1xf32, #tpu.memory_space<vmem>>, vector<4x1xf32>
    %6 = vector.shape_cast %5 : vector<4x1xf32> to vector<4x1xf32>
    %7 = vector.broadcast %6 : vector<4x1xf32> to vector<4x384xf32>
    %c19_i32 = arith.constant 19 : i32
    %8 = tpu.dynamic_rotate %4 by %c19_i32 dim 1 : vector<4x384xf32>, i32 -> vector<4x384xf32>
    %c0_10 = arith.constant 0 : index
    %c0_11 = arith.constant 0 : index
    %c0_12 = arith.constant 0 : index
    %9 = vector.load %arg3[%c0_10, %c0_11, %c0_12] : memref<9x4x4xf32, #tpu.memory_space<vmem>>, vector<1x4x4xf32>
    %10 = vector.shape_cast %9 : vector<1x4x4xf32> to vector<4x4xf32>
    %cst = arith.constant dense<0.000000e+00> : vector<4x384xf32>
    %11 = tpu.matmul %10, %8, %cst {dimension_numbers = #tpu.dot_dimension_numbers<[1], [0], [0], [1], [0, 0, 1, 1], [], []>} : vector<4x4xf32>, vector<4x384xf32>, vector<4x384xf32> -> vector<4x384xf32>
    %12 = arith.addf %7, %11 : vector<4x384xf32>
    %c18_i32 = arith.constant 18 : i32
    %13 = tpu.dynamic_rotate %4 by %c18_i32 dim 1 : vector<4x384xf32>, i32 -> vector<4x384xf32>
    %c1 = arith.constant 1 : index
    %c0_13 = arith.constant 0 : index
    %c0_14 = arith.constant 0 : index
    %14 = vector.load %arg3[%c1, %c0_13, %c0_14] : memref<9x4x4xf32, #tpu.memory_space<vmem>>, vector<1x4x4xf32>
    %15 = vector.shape_cast %14 : vector<1x4x4xf32> to vector<4x4xf32>
    %cst_15 = arith.constant dense<0.000000e+00> : vector<4x384xf32>
    %16 = tpu.matmul %15, %13, %cst_15 {dimension_numbers = #tpu.dot_dimension_numbers<[1], [0], [0], [1], [0, 0, 1, 1], [], []>} : vector<4x4xf32>, vector<4x384xf32>, vector<4x384xf32> -> vector<4x384xf32>
    %17 = arith.addf %12, %16 : vector<4x384xf32>
    %c17_i32 = arith.constant 17 : i32
    %18 = tpu.dynamic_rotate %4 by %c17_i32 dim 1 : vector<4x384xf32>, i32 -> vector<4x384xf32>
    %c2 = arith.constant 2 : index
    %c0_16 = arith.constant 0 : index
    %c0_17 = arith.constant 0 : index
    %19 = vector.load %arg3[%c2, %c0_16, %c0_17] : memref<9x4x4xf32, #tpu.memory_space<vmem>>, vector<1x4x4xf32>
    %20 = vector.shape_cast %19 : vector<1x4x4xf32> to vector<4x4xf32>
    %cst_18 = arith.constant dense<0.000000e+00> : vector<4x384xf32>
    %21 = tpu.matmul %20, %18, %cst_18 {dimension_numbers = #tpu.dot_dimension_numbers<[1], [0], [0], [1], [0, 0, 1, 1], [], []>} : vector<4x4xf32>, vector<4x384xf32>, vector<4x384xf32> -> vector<4x384xf32>
    %22 = arith.addf %17, %21 : vector<4x384xf32>
    %c1_i32 = arith.constant 1 : i32
    %23 = tpu.dynamic_rotate %4 by %c1_i32 dim 1 : vector<4x384xf32>, i32 -> vector<4x384xf32>
    %c3 = arith.constant 3 : index
    %c0_19 = arith.constant 0 : index
    %c0_20 = arith.constant 0 : index
    %24 = vector.load %arg3[%c3, %c0_19, %c0_20] : memref<9x4x4xf32, #tpu.memory_space<vmem>>, vector<1x4x4xf32>
    %25 = vector.shape_cast %24 : vector<1x4x4xf32> to vector<4x4xf32>
    %cst_21 = arith.constant dense<0.000000e+00> : vector<4x384xf32>
    %26 = tpu.matmul %25, %23, %cst_21 {dimension_numbers = #tpu.dot_dimension_numbers<[1], [0], [0], [1], [0, 0, 1, 1], [], []>} : vector<4x4xf32>, vector<4x384xf32>, vector<4x384xf32> -> vector<4x384xf32>
    %27 = arith.addf %22, %26 : vector<4x384xf32>
    %c4 = arith.constant 4 : index
    %c0_22 = arith.constant 0 : index
    %c0_23 = arith.constant 0 : index
    %28 = vector.load %arg3[%c4, %c0_22, %c0_23] : memref<9x4x4xf32, #tpu.memory_space<vmem>>, vector<1x4x4xf32>
    %29 = vector.shape_cast %28 : vector<1x4x4xf32> to vector<4x4xf32>
    %cst_24 = arith.constant dense<0.000000e+00> : vector<4x384xf32>
    %30 = tpu.matmul %29, %4, %cst_24 {dimension_numbers = #tpu.dot_dimension_numbers<[1], [0], [0], [1], [0, 0, 1, 1], [], []>} : vector<4x4xf32>, vector<4x384xf32>, vector<4x384xf32> -> vector<4x384xf32>
    %31 = arith.addf %27, %30 : vector<4x384xf32>
    %c383_i32 = arith.constant 383 : i32
    %32 = tpu.dynamic_rotate %4 by %c383_i32 dim 1 : vector<4x384xf32>, i32 -> vector<4x384xf32>
    %c5 = arith.constant 5 : index
    %c0_25 = arith.constant 0 : index
    %c0_26 = arith.constant 0 : index
    %33 = vector.load %arg3[%c5, %c0_25, %c0_26] : memref<9x4x4xf32, #tpu.memory_space<vmem>>, vector<1x4x4xf32>
    %34 = vector.shape_cast %33 : vector<1x4x4xf32> to vector<4x4xf32>
    %cst_27 = arith.constant dense<0.000000e+00> : vector<4x384xf32>
    %35 = tpu.matmul %34, %32, %cst_27 {dimension_numbers = #tpu.dot_dimension_numbers<[1], [0], [0], [1], [0, 0, 1, 1], [], []>} : vector<4x4xf32>, vector<4x384xf32>, vector<4x384xf32> -> vector<4x384xf32>
    %36 = arith.addf %31, %35 : vector<4x384xf32>
    %c367_i32 = arith.constant 367 : i32
    %37 = tpu.dynamic_rotate %4 by %c367_i32 dim 1 : vector<4x384xf32>, i32 -> vector<4x384xf32>
    %c6 = arith.constant 6 : index
    %c0_28 = arith.constant 0 : index
    %c0_29 = arith.constant 0 : index
    %38 = vector.load %arg3[%c6, %c0_28, %c0_29] : memref<9x4x4xf32, #tpu.memory_space<vmem>>, vector<1x4x4xf32>
    %39 = vector.shape_cast %38 : vector<1x4x4xf32> to vector<4x4xf32>
    %cst_30 = arith.constant dense<0.000000e+00> : vector<4x384xf32>
    %40 = tpu.matmul %39, %37, %cst_30 {dimension_numbers = #tpu.dot_dimension_numbers<[1], [0], [0], [1], [0, 0, 1, 1], [], []>} : vector<4x4xf32>, vector<4x384xf32>, vector<4x384xf32> -> vector<4x384xf32>
    %41 = arith.addf %36, %40 : vector<4x384xf32>
    %c366_i32 = arith.constant 366 : i32
    %42 = tpu.dynamic_rotate %4 by %c366_i32 dim 1 : vector<4x384xf32>, i32 -> vector<4x384xf32>
    %c7 = arith.constant 7 : index
    %c0_31 = arith.constant 0 : index
    %c0_32 = arith.constant 0 : index
    %43 = vector.load %arg3[%c7, %c0_31, %c0_32] : memref<9x4x4xf32, #tpu.memory_space<vmem>>, vector<1x4x4xf32>
    %44 = vector.shape_cast %43 : vector<1x4x4xf32> to vector<4x4xf32>
    %cst_33 = arith.constant dense<0.000000e+00> : vector<4x384xf32>
    %45 = tpu.matmul %44, %42, %cst_33 {dimension_numbers = #tpu.dot_dimension_numbers<[1], [0], [0], [1], [0, 0, 1, 1], [], []>} : vector<4x4xf32>, vector<4x384xf32>, vector<4x384xf32> -> vector<4x384xf32>
    %46 = arith.addf %41, %45 : vector<4x384xf32>
    %c365_i32 = arith.constant 365 : i32
    %47 = tpu.dynamic_rotate %4 by %c365_i32 dim 1 : vector<4x384xf32>, i32 -> vector<4x384xf32>
    %c8 = arith.constant 8 : index
    %c0_34 = arith.constant 0 : index
    %c0_35 = arith.constant 0 : index
    %48 = vector.load %arg3[%c8, %c0_34, %c0_35] : memref<9x4x4xf32, #tpu.memory_space<vmem>>, vector<1x4x4xf32>
    %49 = vector.shape_cast %48 : vector<1x4x4xf32> to vector<4x4xf32>
    %cst_36 = arith.constant dense<0.000000e+00> : vector<4x384xf32>
    %50 = tpu.matmul %49, %47, %cst_36 {dimension_numbers = #tpu.dot_dimension_numbers<[1], [0], [0], [1], [0, 0, 1, 1], [], []>} : vector<4x4xf32>, vector<4x384xf32>, vector<4x384xf32> -> vector<4x384xf32>
    %51 = arith.addf %46, %50 : vector<4x384xf32>
    %cst_37 = arith.constant 0.000000e+00 : f32
    %52 = vector.broadcast %cst_37 : f32 to vector<4x384xf32>
    %53 = arith.maximumf %51, %52 : vector<4x384xf32>
    %54 = vector.broadcast %0 : vector<1x384xf32> to vector<4x384xf32>
    %55 = arith.mulf %53, %54 : vector<4x384xf32>
    %c4_38 = arith.constant 4 : index
    %c0_39 = arith.constant 0 : index
    %56 = vector.load %arg12[%c4_38, %c0_39] : memref<16x384xf32, #tpu.memory_space<vmem>>, vector<4x384xf32>
    tpu.vector_store %arg12[%c4_38, %c0_39], %55 {strides = array<i32>} : memref<16x384xf32, #tpu.memory_space<vmem>>, vector<4x384xf32>,
    %c0_40 = arith.constant 0 : index
    %c0_41 = arith.constant 0 : index
    %57 = vector.load %arg12[%c0_40, %c0_41] : memref<16x384xf32, #tpu.memory_space<vmem>>, vector<8x384xf32>
    %c0_42 = arith.constant 0 : index
    %c0_43 = arith.constant 0 : index
    %58 = vector.load %arg6[%c0_42, %c0_43] : memref<4x1xf32, #tpu.memory_space<vmem>>, vector<4x1xf32>
    %59 = vector.shape_cast %58 : vector<4x1xf32> to vector<4x1xf32>
    %60 = vector.broadcast %59 : vector<4x1xf32> to vector<4x384xf32>
    %c19_i32_44 = arith.constant 19 : i32
    %61 = tpu.dynamic_rotate %57 by %c19_i32_44 dim 1 : vector<8x384xf32>, i32 -> vector<8x384xf32>
    %c0_45 = arith.constant 0 : index
    %c0_46 = arith.constant 0 : index
    %c0_47 = arith.constant 0 : index
    %62 = vector.load %arg5[%c0_45, %c0_46, %c0_47] : memref<9x4x8xf32, #tpu.memory_space<vmem>>, vector<1x4x8xf32>
    %63 = vector.shape_cast %62 : vector<1x4x8xf32> to vector<4x8xf32>
    %cst_48 = arith.constant dense<0.000000e+00> : vector<4x384xf32>
    %64 = tpu.matmul %63, %61, %cst_48 {dimension_numbers = #tpu.dot_dimension_numbers<[1], [0], [0], [1], [0, 0, 1, 1], [], []>} : vector<4x8xf32>, vector<8x384xf32>, vector<4x384xf32> -> vector<4x384xf32>
    %65 = arith.addf %60, %64 : vector<4x384xf32>
    %c18_i32_49 = arith.constant 18 : i32
    %66 = tpu.dynamic_rotate %57 by %c18_i32_49 dim 1 : vector<8x384xf32>, i32 -> vector<8x384xf32>
    %c1_50 = arith.constant 1 : index
    %c0_51 = arith.constant 0 : index
    %c0_52 = arith.constant 0 : index
    %67 = vector.load %arg5[%c1_50, %c0_51, %c0_52] : memref<9x4x8xf32, #tpu.memory_space<vmem>>, vector<1x4x8xf32>
    %68 = vector.shape_cast %67 : vector<1x4x8xf32> to vector<4x8xf32>
    %cst_53 = arith.constant dense<0.000000e+00> : vector<4x384xf32>
    %69 = tpu.matmul %68, %66, %cst_53 {dimension_numbers = #tpu.dot_dimension_numbers<[1], [0], [0], [1], [0, 0, 1, 1], [], []>} : vector<4x8xf32>, vector<8x384xf32>, vector<4x384xf32> -> vector<4x384xf32>
    %70 = arith.addf %65, %69 : vector<4x384xf32>
    %c17_i32_54 = arith.constant 17 : i32
    %71 = tpu.dynamic_rotate %57 by %c17_i32_54 dim 1 : vector<8x384xf32>, i32 -> vector<8x384xf32>
    %c2_55 = arith.constant 2 : index
    %c0_56 = arith.constant 0 : index
    %c0_57 = arith.constant 0 : index
    %72 = vector.load %arg5[%c2_55, %c0_56, %c0_57] : memref<9x4x8xf32, #tpu.memory_space<vmem>>, vector<1x4x8xf32>
    %73 = vector.shape_cast %72 : vector<1x4x8xf32> to vector<4x8xf32>
    %cst_58 = arith.constant dense<0.000000e+00> : vector<4x384xf32>
    %74 = tpu.matmul %73, %71, %cst_58 {dimension_numbers = #tpu.dot_dimension_numbers<[1], [0], [0], [1], [0, 0, 1, 1], [], []>} : vector<4x8xf32>, vector<8x384xf32>, vector<4x384xf32> -> vector<4x384xf32>
    %75 = arith.addf %70, %74 : vector<4x384xf32>
    %c1_i32_59 = arith.constant 1 : i32
    %76 = tpu.dynamic_rotate %57 by %c1_i32_59 dim 1 : vector<8x384xf32>, i32 -> vector<8x384xf32>
    %c3_60 = arith.constant 3 : index
    %c0_61 = arith.constant 0 : index
    %c0_62 = arith.constant 0 : index
    %77 = vector.load %arg5[%c3_60, %c0_61, %c0_62] : memref<9x4x8xf32, #tpu.memory_space<vmem>>, vector<1x4x8xf32>
    %78 = vector.shape_cast %77 : vector<1x4x8xf32> to vector<4x8xf32>
    %cst_63 = arith.constant dense<0.000000e+00> : vector<4x384xf32>
    %79 = tpu.matmul %78, %76, %cst_63 {dimension_numbers = #tpu.dot_dimension_numbers<[1], [0], [0], [1], [0, 0, 1, 1], [], []>} : vector<4x8xf32>, vector<8x384xf32>, vector<4x384xf32> -> vector<4x384xf32>
    %80 = arith.addf %75, %79 : vector<4x384xf32>
    %c4_64 = arith.constant 4 : index
    %c0_65 = arith.constant 0 : index
    %c0_66 = arith.constant 0 : index
    %81 = vector.load %arg5[%c4_64, %c0_65, %c0_66] : memref<9x4x8xf32, #tpu.memory_space<vmem>>, vector<1x4x8xf32>
    %82 = vector.shape_cast %81 : vector<1x4x8xf32> to vector<4x8xf32>
    %cst_67 = arith.constant dense<0.000000e+00> : vector<4x384xf32>
    %83 = tpu.matmul %82, %57, %cst_67 {dimension_numbers = #tpu.dot_dimension_numbers<[1], [0], [0], [1], [0, 0, 1, 1], [], []>} : vector<4x8xf32>, vector<8x384xf32>, vector<4x384xf32> -> vector<4x384xf32>
    %84 = arith.addf %80, %83 : vector<4x384xf32>
    %c383_i32_68 = arith.constant 383 : i32
    %85 = tpu.dynamic_rotate %57 by %c383_i32_68 dim 1 : vector<8x384xf32>, i32 -> vector<8x384xf32>
    %c5_69 = arith.constant 5 : index
    %c0_70 = arith.constant 0 : index
    %c0_71 = arith.constant 0 : index
    %86 = vector.load %arg5[%c5_69, %c0_70, %c0_71] : memref<9x4x8xf32, #tpu.memory_space<vmem>>, vector<1x4x8xf32>
    %87 = vector.shape_cast %86 : vector<1x4x8xf32> to vector<4x8xf32>
    %cst_72 = arith.constant dense<0.000000e+00> : vector<4x384xf32>
    %88 = tpu.matmul %87, %85, %cst_72 {dimension_numbers = #tpu.dot_dimension_numbers<[1], [0], [0], [1], [0, 0, 1, 1], [], []>} : vector<4x8xf32>, vector<8x384xf32>, vector<4x384xf32> -> vector<4x384xf32>
    %89 = arith.addf %84, %88 : vector<4x384xf32>
    %c367_i32_73 = arith.constant 367 : i32
    %90 = tpu.dynamic_rotate %57 by %c367_i32_73 dim 1 : vector<8x384xf32>, i32 -> vector<8x384xf32>
    %c6_74 = arith.constant 6 : index
    %c0_75 = arith.constant 0 : index
    %c0_76 = arith.constant 0 : index
    %91 = vector.load %arg5[%c6_74, %c0_75, %c0_76] : memref<9x4x8xf32, #tpu.memory_space<vmem>>, vector<1x4x8xf32>
    %92 = vector.shape_cast %91 : vector<1x4x8xf32> to vector<4x8xf32>
    %cst_77 = arith.constant dense<0.000000e+00> : vector<4x384xf32>
    %93 = tpu.matmul %92, %90, %cst_77 {dimension_numbers = #tpu.dot_dimension_numbers<[1], [0], [0], [1], [0, 0, 1, 1], [], []>} : vector<4x8xf32>, vector<8x384xf32>, vector<4x384xf32> -> vector<4x384xf32>
    %94 = arith.addf %89, %93 : vector<4x384xf32>
    %c366_i32_78 = arith.constant 366 : i32
    %95 = tpu.dynamic_rotate %57 by %c366_i32_78 dim 1 : vector<8x384xf32>, i32 -> vector<8x384xf32>
    %c7_79 = arith.constant 7 : index
    %c0_80 = arith.constant 0 : index
    %c0_81 = arith.constant 0 : index
    %96 = vector.load %arg5[%c7_79, %c0_80, %c0_81] : memref<9x4x8xf32, #tpu.memory_space<vmem>>, vector<1x4x8xf32>
    %97 = vector.shape_cast %96 : vector<1x4x8xf32> to vector<4x8xf32>
    %cst_82 = arith.constant dense<0.000000e+00> : vector<4x384xf32>
    %98 = tpu.matmul %97, %95, %cst_82 {dimension_numbers = #tpu.dot_dimension_numbers<[1], [0], [0], [1], [0, 0, 1, 1], [], []>} : vector<4x8xf32>, vector<8x384xf32>, vector<4x384xf32> -> vector<4x384xf32>
    %99 = arith.addf %94, %98 : vector<4x384xf32>
    %c365_i32_83 = arith.constant 365 : i32
    %100 = tpu.dynamic_rotate %57 by %c365_i32_83 dim 1 : vector<8x384xf32>, i32 -> vector<8x384xf32>
    %c8_84 = arith.constant 8 : index
    %c0_85 = arith.constant 0 : index
    %c0_86 = arith.constant 0 : index
    %101 = vector.load %arg5[%c8_84, %c0_85, %c0_86] : memref<9x4x8xf32, #tpu.memory_space<vmem>>, vector<1x4x8xf32>
    %102 = vector.shape_cast %101 : vector<1x4x8xf32> to vector<4x8xf32>
    %cst_87 = arith.constant dense<0.000000e+00> : vector<4x384xf32>
    %103 = tpu.matmul %102, %100, %cst_87 {dimension_numbers = #tpu.dot_dimension_numbers<[1], [0], [0], [1], [0, 0, 1, 1], [], []>} : vector<4x8xf32>, vector<8x384xf32>, vector<4x384xf32> -> vector<4x384xf32>
    %104 = arith.addf %99, %103 : vector<4x384xf32>
    %cst_88 = arith.constant 0.000000e+00 : f32
    %105 = vector.broadcast %cst_88 : f32 to vector<4x384xf32>
    %106 = arith.maximumf %104, %105 : vector<4x384xf32>
    %107 = vector.broadcast %0 : vector<1x384xf32> to vector<4x384xf32>
    %108 = arith.mulf %106, %107 : vector<4x384xf32>
    %c8_89 = arith.constant 8 : index
    %c0_90 = arith.constant 0 : index
    %109 = vector.load %arg12[%c8_89, %c0_90] : memref<16x384xf32, #tpu.memory_space<vmem>>, vector<4x384xf32>
    tpu.vector_store %arg12[%c8_89, %c0_90], %108 {strides = array<i32>} : memref<16x384xf32, #tpu.memory_space<vmem>>, vector<4x384xf32>,
    %c0_91 = arith.constant 0 : index
    %c0_92 = arith.constant 0 : index
    %110 = vector.load %arg12[%c0_91, %c0_92] : memref<16x384xf32, #tpu.memory_space<vmem>>, vector<12x384xf32>
    %c0_93 = arith.constant 0 : index
    %c0_94 = arith.constant 0 : index
    %111 = vector.load %arg8[%c0_93, %c0_94] : memref<4x1xf32, #tpu.memory_space<vmem>>, vector<4x1xf32>
    %112 = vector.shape_cast %111 : vector<4x1xf32> to vector<4x1xf32>
    %113 = vector.broadcast %112 : vector<4x1xf32> to vector<4x384xf32>
    %c19_i32_95 = arith.constant 19 : i32
    %114 = tpu.dynamic_rotate %110 by %c19_i32_95 dim 1 : vector<12x384xf32>, i32 -> vector<12x384xf32>
    %c0_96 = arith.constant 0 : index
    %c0_97 = arith.constant 0 : index
    %c0_98 = arith.constant 0 : index
    %115 = vector.load %arg7[%c0_96, %c0_97, %c0_98] : memref<9x4x12xf32, #tpu.memory_space<vmem>>, vector<1x4x12xf32>
    %116 = vector.shape_cast %115 : vector<1x4x12xf32> to vector<4x12xf32>
    %cst_99 = arith.constant dense<0.000000e+00> : vector<4x384xf32>
    %117 = tpu.matmul %116, %114, %cst_99 {dimension_numbers = #tpu.dot_dimension_numbers<[1], [0], [0], [1], [0, 0, 1, 1], [], []>} : vector<4x12xf32>, vector<12x384xf32>, vector<4x384xf32> -> vector<4x384xf32>
    %118 = arith.addf %113, %117 : vector<4x384xf32>
    %c18_i32_100 = arith.constant 18 : i32
    %119 = tpu.dynamic_rotate %110 by %c18_i32_100 dim 1 : vector<12x384xf32>, i32 -> vector<12x384xf32>
    %c1_101 = arith.constant 1 : index
    %c0_102 = arith.constant 0 : index
    %c0_103 = arith.constant 0 : index
    %120 = vector.load %arg7[%c1_101, %c0_102, %c0_103] : memref<9x4x12xf32, #tpu.memory_space<vmem>>, vector<1x4x12xf32>
    %121 = vector.shape_cast %120 : vector<1x4x12xf32> to vector<4x12xf32>
    %cst_104 = arith.constant dense<0.000000e+00> : vector<4x384xf32>
    %122 = tpu.matmul %121, %119, %cst_104 {dimension_numbers = #tpu.dot_dimension_numbers<[1], [0], [0], [1], [0, 0, 1, 1], [], []>} : vector<4x12xf32>, vector<12x384xf32>, vector<4x384xf32> -> vector<4x384xf32>
    %123 = arith.addf %118, %122 : vector<4x384xf32>
    %c17_i32_105 = arith.constant 17 : i32
    %124 = tpu.dynamic_rotate %110 by %c17_i32_105 dim 1 : vector<12x384xf32>, i32 -> vector<12x384xf32>
    %c2_106 = arith.constant 2 : index
    %c0_107 = arith.constant 0 : index
    %c0_108 = arith.constant 0 : index
    %125 = vector.load %arg7[%c2_106, %c0_107, %c0_108] : memref<9x4x12xf32, #tpu.memory_space<vmem>>, vector<1x4x12xf32>
    %126 = vector.shape_cast %125 : vector<1x4x12xf32> to vector<4x12xf32>
    %cst_109 = arith.constant dense<0.000000e+00> : vector<4x384xf32>
    %127 = tpu.matmul %126, %124, %cst_109 {dimension_numbers = #tpu.dot_dimension_numbers<[1], [0], [0], [1], [0, 0, 1, 1], [], []>} : vector<4x12xf32>, vector<12x384xf32>, vector<4x384xf32> -> vector<4x384xf32>
    %128 = arith.addf %123, %127 : vector<4x384xf32>
    %c1_i32_110 = arith.constant 1 : i32
    %129 = tpu.dynamic_rotate %110 by %c1_i32_110 dim 1 : vector<12x384xf32>, i32 -> vector<12x384xf32>
    %c3_111 = arith.constant 3 : index
    %c0_112 = arith.constant 0 : index
    %c0_113 = arith.constant 0 : index
    %130 = vector.load %arg7[%c3_111, %c0_112, %c0_113] : memref<9x4x12xf32, #tpu.memory_space<vmem>>, vector<1x4x12xf32>
    %131 = vector.shape_cast %130 : vector<1x4x12xf32> to vector<4x12xf32>
    %cst_114 = arith.constant dense<0.000000e+00> : vector<4x384xf32>
    %132 = tpu.matmul %131, %129, %cst_114 {dimension_numbers = #tpu.dot_dimension_numbers<[1], [0], [0], [1], [0, 0, 1, 1], [], []>} : vector<4x12xf32>, vector<12x384xf32>, vector<4x384xf32> -> vector<4x384xf32>
    %133 = arith.addf %128, %132 : vector<4x384xf32>
    %c4_115 = arith.constant 4 : index
    %c0_116 = arith.constant 0 : index
    %c0_117 = arith.constant 0 : index
    %134 = vector.load %arg7[%c4_115, %c0_116, %c0_117] : memref<9x4x12xf32, #tpu.memory_space<vmem>>, vector<1x4x12xf32>
    %135 = vector.shape_cast %134 : vector<1x4x12xf32> to vector<4x12xf32>
    %cst_118 = arith.constant dense<0.000000e+00> : vector<4x384xf32>
    %136 = tpu.matmul %135, %110, %cst_118 {dimension_numbers = #tpu.dot_dimension_numbers<[1], [0], [0], [1], [0, 0, 1, 1], [], []>} : vector<4x12xf32>, vector<12x384xf32>, vector<4x384xf32> -> vector<4x384xf32>
    %137 = arith.addf %133, %136 : vector<4x384xf32>
    %c383_i32_119 = arith.constant 383 : i32
    %138 = tpu.dynamic_rotate %110 by %c383_i32_119 dim 1 : vector<12x384xf32>, i32 -> vector<12x384xf32>
    %c5_120 = arith.constant 5 : index
    %c0_121 = arith.constant 0 : index
    %c0_122 = arith.constant 0 : index
    %139 = vector.load %arg7[%c5_120, %c0_121, %c0_122] : memref<9x4x12xf32, #tpu.memory_space<vmem>>, vector<1x4x12xf32>
    %140 = vector.shape_cast %139 : vector<1x4x12xf32> to vector<4x12xf32>
    %cst_123 = arith.constant dense<0.000000e+00> : vector<4x384xf32>
    %141 = tpu.matmul %140, %138, %cst_123 {dimension_numbers = #tpu.dot_dimension_numbers<[1], [0], [0], [1], [0, 0, 1, 1], [], []>} : vector<4x12xf32>, vector<12x384xf32>, vector<4x384xf32> -> vector<4x384xf32>
    %142 = arith.addf %137, %141 : vector<4x384xf32>
    %c367_i32_124 = arith.constant 367 : i32
    %143 = tpu.dynamic_rotate %110 by %c367_i32_124 dim 1 : vector<12x384xf32>, i32 -> vector<12x384xf32>
    %c6_125 = arith.constant 6 : index
    %c0_126 = arith.constant 0 : index
    %c0_127 = arith.constant 0 : index
    %144 = vector.load %arg7[%c6_125, %c0_126, %c0_127] : memref<9x4x12xf32, #tpu.memory_space<vmem>>, vector<1x4x12xf32>
    %145 = vector.shape_cast %144 : vector<1x4x12xf32> to vector<4x12xf32>
    %cst_128 = arith.constant dense<0.000000e+00> : vector<4x384xf32>
    %146 = tpu.matmul %145, %143, %cst_128 {dimension_numbers = #tpu.dot_dimension_numbers<[1], [0], [0], [1], [0, 0, 1, 1], [], []>} : vector<4x12xf32>, vector<12x384xf32>, vector<4x384xf32> -> vector<4x384xf32>
    %147 = arith.addf %142, %146 : vector<4x384xf32>
    %c366_i32_129 = arith.constant 366 : i32
    %148 = tpu.dynamic_rotate %110 by %c366_i32_129 dim 1 : vector<12x384xf32>, i32 -> vector<12x384xf32>
    %c7_130 = arith.constant 7 : index
    %c0_131 = arith.constant 0 : index
    %c0_132 = arith.constant 0 : index
    %149 = vector.load %arg7[%c7_130, %c0_131, %c0_132] : memref<9x4x12xf32, #tpu.memory_space<vmem>>, vector<1x4x12xf32>
    %150 = vector.shape_cast %149 : vector<1x4x12xf32> to vector<4x12xf32>
    %cst_133 = arith.constant dense<0.000000e+00> : vector<4x384xf32>
    %151 = tpu.matmul %150, %148, %cst_133 {dimension_numbers = #tpu.dot_dimension_numbers<[1], [0], [0], [1], [0, 0, 1, 1], [], []>} : vector<4x12xf32>, vector<12x384xf32>, vector<4x384xf32> -> vector<4x384xf32>
    %152 = arith.addf %147, %151 : vector<4x384xf32>
    %c365_i32_134 = arith.constant 365 : i32
    %153 = tpu.dynamic_rotate %110 by %c365_i32_134 dim 1 : vector<12x384xf32>, i32 -> vector<12x384xf32>
    %c8_135 = arith.constant 8 : index
    %c0_136 = arith.constant 0 : index
    %c0_137 = arith.constant 0 : index
    %154 = vector.load %arg7[%c8_135, %c0_136, %c0_137] : memref<9x4x12xf32, #tpu.memory_space<vmem>>, vector<1x4x12xf32>
    %155 = vector.shape_cast %154 : vector<1x4x12xf32> to vector<4x12xf32>
    %cst_138 = arith.constant dense<0.000000e+00> : vector<4x384xf32>
    %156 = tpu.matmul %155, %153, %cst_138 {dimension_numbers = #tpu.dot_dimension_numbers<[1], [0], [0], [1], [0, 0, 1, 1], [], []>} : vector<4x12xf32>, vector<12x384xf32>, vector<4x384xf32> -> vector<4x384xf32>
    %157 = arith.addf %152, %156 : vector<4x384xf32>
    %cst_139 = arith.constant 0.000000e+00 : f32
    %158 = vector.broadcast %cst_139 : f32 to vector<4x384xf32>
    %159 = arith.maximumf %157, %158 : vector<4x384xf32>
    %160 = vector.broadcast %0 : vector<1x384xf32> to vector<4x384xf32>
    %161 = arith.mulf %159, %160 : vector<4x384xf32>
    %c12 = arith.constant 12 : index
    %c0_140 = arith.constant 0 : index
    %162 = vector.load %arg12[%c12, %c0_140] : memref<16x384xf32, #tpu.memory_space<vmem>>, vector<4x384xf32>
    tpu.vector_store %arg12[%c12, %c0_140], %161 {strides = array<i32>} : memref<16x384xf32, #tpu.memory_space<vmem>>, vector<4x384xf32>,
    %c0_141 = arith.constant 0 : index
    %c0_142 = arith.constant 0 : index
    %163 = vector.load %arg9[%c0_141, %c0_142] : memref<4x16xf32, #tpu.memory_space<vmem>>, vector<4x16xf32>
    %c0_143 = arith.constant 0 : index
    %c0_144 = arith.constant 0 : index
    %164 = vector.load %arg12[%c0_143, %c0_144] : memref<16x384xf32, #tpu.memory_space<vmem>>, vector<16x384xf32>
    %cst_145 = arith.constant dense<0.000000e+00> : vector<4x384xf32>
    %165 = tpu.matmul %163, %164, %cst_145 {dimension_numbers = #tpu.dot_dimension_numbers<[1], [0], [0], [1], [0, 0, 1, 1], [], []>} : vector<4x16xf32>, vector<16x384xf32>, vector<4x384xf32> -> vector<4x384xf32>
    %c0_146 = arith.constant 0 : index
    %c0_147 = arith.constant 0 : index
    %166 = vector.load %arg10[%c0_146, %c0_147] : memref<4x1xf32, #tpu.memory_space<vmem>>, vector<4x1xf32>
    %167 = vector.broadcast %166 : vector<4x1xf32> to vector<4x384xf32>
    %168 = arith.addf %165, %167 : vector<4x384xf32>
    %c0_148 = arith.constant 0 : index
    %c0_149 = arith.constant 0 : index
    %169 = vector.load %arg12[%c0_148, %c0_149] : memref<16x384xf32, #tpu.memory_space<vmem>>, vector<4x384xf32>
    %170 = arith.addf %168, %169 : vector<4x384xf32>
    %c0_150 = arith.constant 0 : index
    %c0_151 = arith.constant 0 : index
    %c0_152 = arith.constant 0 : index
    %171 = vector.load %arg11[%c0_150, %c0_151, %c0_152] : memref<1x4x384xf32, #tpu.memory_space<vmem>>, vector<1x4x384xf32>
    %172 = vector.shape_cast %171 : vector<1x4x384xf32> to vector<4x384xf32>
    %173 = vector.shape_cast %170 : vector<4x384xf32> to vector<1x4x384xf32>
    tpu.vector_store %arg11[%c0_150, %c0_151, %c0_152], %173 {strides = array<i32>} : memref<1x4x384xf32, #tpu.memory_space<vmem>>, vector<1x4x384xf32>,
    return
  }
  func.func @transform_0(%arg0: i32) -> (i32, i32, i32) {
    %c0_i32 = arith.constant 0 : i32
    %c0_i32_0 = arith.constant 0 : i32
    %c0_i32_1 = arith.constant 0 : i32
    return %arg0, %c0_i32, %c0_i32_0 : i32, i32, i32
  }
  func.func @transform_1(%arg0: i32) -> (i32, i32) {
    %c0_i32 = arith.constant 0 : i32
    %c0_i32_0 = arith.constant 0 : i32
    %c0_i32_1 = arith.constant 0 : i32
    return %c0_i32, %c0_i32_0 : i32, i32
  }
  func.func @transform_2(%arg0: i32) -> (i32, i32, i32) {
    %c0_i32 = arith.constant 0 : i32
    %c0_i32_0 = arith.constant 0 : i32
    %c0_i32_1 = arith.constant 0 : i32
    %c0_i32_2 = arith.constant 0 : i32
    return %c0_i32, %c0_i32_0, %c0_i32_1 : i32, i32, i32
  }
  func.func @transform_3(%arg0: i32) -> (i32, i32) {
    %c0_i32 = arith.constant 0 : i32
    %c0_i32_0 = arith.constant 0 : i32
    %c0_i32_1 = arith.constant 0 : i32
    return %c0_i32, %c0_i32_0 : i32, i32
  }
  func.func @transform_4(%arg0: i32) -> (i32, i32, i32) {
    %c0_i32 = arith.constant 0 : i32
    %c0_i32_0 = arith.constant 0 : i32
    %c0_i32_1 = arith.constant 0 : i32
    %c0_i32_2 = arith.constant 0 : i32
    return %c0_i32, %c0_i32_0, %c0_i32_1 : i32, i32, i32
  }
  func.func @transform_5(%arg0: i32) -> (i32, i32) {
    %c0_i32 = arith.constant 0 : i32
    %c0_i32_0 = arith.constant 0 : i32
    %c0_i32_1 = arith.constant 0 : i32
    return %c0_i32, %c0_i32_0 : i32, i32
  }
  func.func @transform_6(%arg0: i32) -> (i32, i32, i32) {
    %c0_i32 = arith.constant 0 : i32
    %c0_i32_0 = arith.constant 0 : i32
    %c0_i32_1 = arith.constant 0 : i32
    %c0_i32_2 = arith.constant 0 : i32
    return %c0_i32, %c0_i32_0, %c0_i32_1 : i32, i32, i32
  }
  func.func @transform_7(%arg0: i32) -> (i32, i32) {
    %c0_i32 = arith.constant 0 : i32
    %c0_i32_0 = arith.constant 0 : i32
    %c0_i32_1 = arith.constant 0 : i32
    return %c0_i32, %c0_i32_0 : i32, i32
  }
  func.func @transform_8(%arg0: i32) -> (i32, i32) {
    %c0_i32 = arith.constant 0 : i32
    %c0_i32_0 = arith.constant 0 : i32
    %c0_i32_1 = arith.constant 0 : i32
    return %c0_i32, %c0_i32_0 : i32, i32
  }
  func.func @transform_9(%arg0: i32) -> (i32, i32) {
    %c0_i32 = arith.constant 0 : i32
    %c0_i32_0 = arith.constant 0 : i32
    %c0_i32_1 = arith.constant 0 : i32
    return %c0_i32, %c0_i32_0 : i32, i32
  }
  func.func @transform_10(%arg0: i32) -> (i32, i32, i32) {
    %c0_i32 = arith.constant 0 : i32
    %c0_i32_0 = arith.constant 0 : i32
    %c0_i32_1 = arith.constant 0 : i32
    return %arg0, %c0_i32, %c0_i32_0 : i32, i32, i32
  }
}

</mosaic_0001>

<bundles_post_ra>
// kernel: tpu_custom_call.1
= control target key start
LH: loop header
LB: loop body
LE: loop exit
PB: predicated region body
PF: predicated region fallthrough
CT: control target
= control target key end

     0   :  { %15 = vsyncpa [#allocation4], 0  ;;  %s4154_s0 = inlined_call_operand.vmem [shape: f32[2,4,384], index: 0, kind: input, shape index: {}]   ;;  %s4155_s1 = inlined_call_operand.vmem [shape: f32[1,384], index: 1, kind: input, shape index: {}]   ;;  %s4156_s2 = inlined_call_operand.vmem [shape: f32[9,4,4], index: 2, kind: input, shape index: {}]   ;;  %s4157_s3 = inlined_call_operand.vmem [shape: f32[4,1], index: 3, kind: input, shape index: {}]   ;;  %s4158_s4 = inlined_call_operand.vmem [shape: f32[9,4,8], index: 4, kind: input, shape index: {}]   ;;  %s4159_s5 = inlined_call_operand.vmem [shape: f32[4,1], index: 5, kind: input, shape index: {}]   ;;  %s4160_s6 = inlined_call_operand.vmem [shape: f32[9,4,12], index: 6, kind: input, shape index: {}]   ;;  %s4161_s7 = inlined_call_operand.vmem [shape: f32[4,1], index: 7, kind: input, shape index: {}]   ;;  %s4162_s8 = inlined_call_operand.vmem [shape: f32[4,16], index: 8, kind: input, shape index: {}]   ;;  %s4163_s9 = inlined_call_operand.vmem [shape: f32[4,1], index: 9, kind: input, shape index: {}]   ;;  %s4164_s10 = inlined_call_operand.hbm [shape: f32[2,4,384], index: 10, kind: output, shape index: {}]  }
   0x1   :  { %17 = vsyncpa [#allocation4 + $0x1], 0  ;;  %s3351_s13 = smov 0   ;;  %s3353_s14 = smov 0  }
   0x2   :  { %s3355_s15 = smov 0   ;;  %s3357_s16 = smov 0  }
   0x3 LB: > { %s3372_s17 = sadd.s32 4294967295, %s3285_s16   ;;  %s2920_s18 = sadd.s32 4294967294, %s3285_s16   ;;  %s3285_s16 = sphi %s3357_s16, %s4176_s16   ;;  %s3281_s15 = sphi %s3355_s15, %s4175_s15   ;;  %s3277_s14 = sphi %s3353_s14, %s4174_s14   ;;  %s3273_s13 = sphi %s3351_s13, %s4173_s13  }
   0x4   : > { %s3376_s19 = sadd.s32 1, %s3285_s16   ;;  %s245_s20 = sadd.s32 1, %s3281_s15 }
   0x5   : > { %s242_s21 = ssub.s32 %s3285_s16, %s3376_s19  ;;  %p255_p0 = scmp.ne.s32.totalorder %s3281_s15, %s3277_s14 }
   0x6   : > { %p243_p1 = scmp.eq.s32.totalorder %s242_s21, 0  ;;  %p256_p2 = scmp.eq.s32.totalorder %s3372_s17, 1 }
   0x7   : > { %p261_p3 = scmp.ne.s32.totalorder %s3277_s14, %s3273_s13  ;;  %p262_p4 = scmp.eq.s32.totalorder %s2920_s18, 1 }
   0x8   : > { %s3387_s22 = scalar_select %p243_p1, %s3281_s15, %s245_s20  }
   0x9   : > { %p3389_p5 = por %p256_p2, %p255_p0  ;;  %p3393_p6 = por %p262_p4, %p261_p3 }
   0xa   : > { %p2923_p7 = scmp.ge.s32.totalorder %s3285_s16, 1  ;;  %p315_p8 = scmp.lt.s32.totalorder %s3285_s16, 3 }
   0xc   : > { %p316_p9 = pnand %p2923_p7, %p315_p8 }
   0xd   : > { %p353_p10 = scmp.lt.s32.totalorder (!%p316_p9), %s3372_s17, 1  ;;  %s3287_s30 = smov (!%p316_p9), 19  }
   0xe   : > { %319 = sbr.rel (%p316_p9) target bundleno = 1167 (0x48f), region = 60  ;;  %s3288_s11 = smov (!%p316_p9), 18  }
   0xf   : > { %s3289_s12 = smov (!%p316_p9), 17   ;;  %s3290_s18 = smov (!%p316_p9), 1  }
  0x10   : > { %s3291_s20 = smov (!%p316_p9), 127   ;;  %s4167_s21 = smov (!%p316_p9), 111  }
  0x11   : > { %s4171_s28 = smov (!%p316_p9), 110  }
  0x13   : > { %s354_s25 = scalar_select %p353_p10, %s3372_s17, 1  ;;  %v390_v9 = vlaneseq  ;;  %v3295_v12 = vmov 0   ;;  %v378_v13 = vld [vmem:[%s4157_s3] sm:$0xf]  ;;  %vm401_vm1 = vcmask 1043456   ;;  %vm397_vm2 = vcmask 31744  }
  0x14   : > { %3141 = vset.pattern.permute.xlu0 %v3295_v12  ;;  %3222 = vset.pattern.permute.xlu2 %v3295_v12  ;;  %v396_v16 = vld [vmem:[%s4156_s2] sm:$0xf]  ;;  %v2931_v23 = vld [vmem:[%s4156_s2 + $0x4] sm:$0xf]  ;;  %v2938_v32 = vld [vmem:[%s4156_s2 + $0x8] sm:$0xf] }
  0x15   : > { %s3091_s26 = smul.u32 12, %s354_s25  ;;  %s4165_s25 = smov 110   ;;  %v3458_v10 = vand.u32 127, %v390_v9  ;;  %v2945_v37 = vld [vmem:[%s4156_s2 + $0xc] sm:$0xf]  ;;  %vm1204_vm10 = vcmask 64512  }
  0x16   : > { %v2952_v43 = vld [vmem:[%s4156_s2 + $0x10] sm:$0xf]  ;;  %v2959_v45 = vld [vmem:[%s4156_s2 + $0x14] sm:$0xf]  ;;  %v2966_v53 = vld [vmem:[%s4156_s2 + $0x18] sm:$0xf] }
  0x17   : > { %s357_s29 = scalar_lea.vmem %s4154_s0, %s3091_s26  ;;  %s3294_s26 = smov 109   ;;  %vm392_vm0 = vcmp.lt.s32.totalorder %v3458_v10, 19  ;;  %vm480_vm3 = vcmp.lt.s32.totalorder %v3458_v10, 18  ;;  %vm567_vm4 = vcmp.lt.s32.totalorder %v3458_v10, 17  ;;  %vm654_vm5 = vcmp.lt.s32.totalorder %v3458_v10, 1 }
  0x18   : > { %v359_v0 = vld [vmem:[%s357_s29] sm:$0xff]  ;;  %v360_v1 = vld [vmem:[%s357_s29 + $0x8] sm:$0xf]  ;;  %vm818_vm6 = vcmp.lt.s32.totalorder %v3458_v10, 127  ;;  %vm905_vm7 = vcmp.lt.s32.totalorder %v3458_v10, 111  ;;  %vm992_vm8 = vcmp.lt.s32.totalorder %v3458_v10, 110 }
  0x19   : > { %363 = vst [vmem:[#allocation1] ss:$2 sm:$0xff] %v359_v0  ;;  %v2973_v59 = vld [vmem:[%s4156_s2 + $0x1c] sm:$0xf]  ;;  %vm1079_vm9 = vcmp.lt.s32.totalorder %v3458_v10, 109  ;;  %vm1918_vm11 = vcmask 97280  }
  0x1a   : > { %365 = vst [vmem:[#allocation1 + $0x10] ss:$2 sm:$0xff] %v360_v1  ;;  %vm2767_vm12 = vcmask 130048  }
  0x20   : > { %v367_v2 = vld.sshfl [vmem:[#allocation1 + $0x8] sm:$0xff pattern:$0x75316420]  ;;  %v366_v3 = vld.sshfl [vmem:[#allocation1] sm:$0xff pattern:$0x75316420] }
  0x21   : > { %373 = vst [vmem:[#allocation2 + $0x10] sm:$0xf] %v367_v2  ;;  %v368_v4 = vld.sshfl [vmem:[#allocation1 + $0x10] sm:$0xff pattern:$0x75316420] }
  0x22   : > { %372 = vst [vmem:[#allocation2 + $0x28] sm:$0xf] %v366_v3  ;;  %v2980_v2 = vld [vmem:[%s4156_s2 + $0x20] sm:$0xf] }
  0x23   : > { %374 = vst [vmem:[#allocation2 + $0x8] sm:$0xf] %v368_v4 }
  0x28   : > { %v3404_v5 = vld [vmem:[#allocation2 + $0x10] sm:$0xf] }
  0x29   : > { %386 = vrot.lane.b32.xlu0 %v3404_v5, %s3287_s30  ;;  %v3408_v6 = vld [vmem:[#allocation2 + $0x28] sm:$0xf] }
  0x2a   : > { %384 = vrot.lane.b32.xlu1 %v3408_v6, %s3287_s30  ;;  %v3412_v7 = vld [vmem:[#allocation2 + $0x8] sm:$0xf] }
  0x2b   : > { %478 = vrot.lane.b32.xlu2 %v3412_v7, %s3288_s11 }
  0x31   : > { %388 = vrot.lane.b32.xlu0 %v3412_v7, %s3287_s30 }
  0x32   : > { %474 = vrot.lane.b32.xlu1 %v3408_v6, %s3288_s11 }
  0x33   : > { %561 = vrot.lane.b32.xlu2 %v3408_v6, %s3289_s12 }
  0x39   : > { %565 = vrot.lane.b32.xlu0 %v3412_v7, %s3289_s12 }
  0x3a   : > { %476 = vrot.lane.b32.xlu1 %v3404_v5, %s3288_s11 }
  0x3b   : > { %563 = vrot.lane.b32.xlu2 %v3404_v5, %s3289_s12 }
  0x41   : > { %648 = vrot.lane.b32.xlu0 %v3408_v6, %s3290_s18 }
  0x42   : > { %650 = vrot.lane.b32.xlu1 %v3404_v5, %s3290_s18 }
  0x43   : > { %652 = vrot.lane.b32.xlu2 %v3412_v7, %s3290_s18 }
  0x49   : > { %812 = vrot.lane.b32.xlu0 %v3408_v6, %s3291_s20 }
  0x4a   : > { %814 = vrot.lane.b32.xlu1 %v3404_v5, %s3291_s20 }
  0x4b   : > { %899 = vrot.lane.b32.xlu2 %v3408_v6, %s4167_s21 }
  0x51   : > { %901 = vrot.lane.b32.xlu0 %v3404_v5, %s4167_s21 }
  0x52   : > { %816 = vrot.lane.b32.xlu1 %v3412_v7, %s3291_s20 }
  0x53   : > { %903 = vrot.lane.b32.xlu2 %v3412_v7, %s4167_s21 }
  0x59   : > { %988 = vrot.lane.b32.xlu0 %v3404_v5, %s4165_s25 }
  0x5a   : > { %990 = vrot.lane.b32.xlu1 %v3412_v7, %s4165_s25 }
  0x5b   : > { %986 = vrot.lane.b32.xlu2 %v3408_v6, %s4165_s25 }
  0x61   : > { %1073 = vrot.lane.b32.xlu0 %v3408_v6, %s3294_s26 }
  0x62   : > { %1077 = vrot.lane.b32.xlu1 %v3412_v7, %s3294_s26 }
  0x63   : > { %1075 = vrot.lane.b32.xlu2 %v3404_v5, %s3294_s26 }
  0x69   : > { %381 = vperm.xlu0 %3141, %v378_v13  }
  0x85   : > { %v479_v8 = vpop.permute.xlu2 %478 }
  0x8d   : > { %v562_v11 = vpop.permute.xlu2 %561 }
  0x95   : > { %v564_v18 = vpop.permute.xlu2 %563 }
  0x96   : > { %v569_v25 = vsel %vm567_vm4, %v562_v11, %v564_v18 }
  0x9b   : > { %v387_v14 = vpop.permute.xlu0 %386 }
  0x9c   : > { %v385_v15 = vpop.permute.xlu1 %384 }
  0x9d   : > { %v394_v17 = vsel %vm392_vm0, %v385_v15, %v387_v14  ;;  %v653_v27 = vpop.permute.xlu2 %652 }
  0x9e   : > { %2927 = vmatpush.msk.msra.mxu1 %vm401_vm1, %v394_v17 }
  0x9f   : > { %2928 = vmatmul.msk.f32.vlgmr.msra.gmra.mxu1 %vm397_vm2, %v396_v16 }
  0xa3   : > { %v389_v19 = vpop.permute.xlu0 %388 }
  0xa4   : > { %v475_v20 = vpop.permute.xlu1 %474  ;;  %v395_v21 = vsel %vm392_vm0, %v389_v19, %v385_v15  ;;  %v393_v22 = vsel %vm392_vm0, %v387_v14, %v389_v19 }
  0xa5   : > { %2925 = vmatpush.msk.msra.mxu0 %vm401_vm1, %v395_v21  ;;  %2929 = vmatpush.msk.msra.mxu2 %vm401_vm1, %v393_v22  ;;  %v483_v24 = vsel %vm480_vm3, %v479_v8, %v475_v20  ;;  %v900_v40 = vpop.permute.xlu2 %899 }
  0xa6   : > { %2932 = vmatpush.msk.msra.mxu3 %vm401_vm1, %v483_v24  ;;  %2926 = vmatmul.msk.f32.vlgmr.msra.gmra.mxu0 %vm397_vm2, %v396_v16 }
  0xa7   : > { %2930 = vmatmul.msk.f32.vlgmr.msra.gmra.mxu2 %vm397_vm2, %v396_v16  ;;  %2933 = vmatmul.msk.f32.vlgmr.msra.gmra.mxu3 %vm397_vm2, %v2931_v23 }
  0xa8   : > { %2941 = vmatpush.msk.msrb.mxu3 %vm401_vm1, %v569_v25 }
  0xab   : > { %v566_v26 = vpop.permute.xlu0 %565 }
  0xac   : > { %v477_v28 = vpop.permute.xlu1 %476  ;;  %v570_v29 = vsel %vm567_vm4, %v566_v26, %v562_v11  ;;  %v568_v33 = vsel %vm567_vm4, %v564_v18, %v566_v26 }
  0xad   : > { %v482_v30 = vsel %vm480_vm3, %v475_v20, %v477_v28  ;;  %v481_v31 = vsel %vm480_vm3, %v477_v28, %v479_v8  ;;  %2939 = vmatpush.msk.msrb.mxu2 %vm401_vm1, %v570_v29  ;;  %v904_v46 = vpop.permute.xlu2 %903 }
  0xae   : > { %2934 = vmatpush.msk.msrb.mxu0 %vm401_vm1, %v482_v30  ;;  %2936 = vmatpush.msk.msrb.mxu1 %vm401_vm1, %v481_v31  ;;  %v908_v55 = vsel %vm905_vm7, %v904_v46, %v900_v40 }
  0xaf   : > { %2935 = vmatmul.msk.f32.vlgmr.msrb.gmra.mxu0 %vm397_vm2, %v2931_v23  ;;  %2937 = vmatmul.msk.f32.vlgmr.msrb.gmra.mxu1 %vm397_vm2, %v2931_v23 }
  0xb0   : > { %2940 = vmatmul.msk.f32.vlgmr.msrb.gmra.mxu2 %vm397_vm2, %v2938_v32  ;;  %2942 = vmatmul.msk.f32.vlgmr.msrb.gmra.mxu3 %vm397_vm2, %v2938_v32 }
  0xb1   : > { %2943 = vmatpush.msk.msra.mxu0 %vm401_vm1, %v568_v33 }
  0xb3   : > { %2953 = vmatpush.msk.msrb.mxu0 %vm401_vm1, %v3408_v6  ;;  %v649_v34 = vpop.permute.xlu0 %648 }
  0xb4   : > { %v657_v35 = vsel %vm654_vm5, %v653_v27, %v649_v34  ;;  %v651_v36 = vpop.permute.xlu1 %650 }
  0xb5   : > { %v655_v38 = vsel %vm654_vm5, %v651_v36, %v653_v27  ;;  %v656_v39 = vsel %vm654_vm5, %v649_v34, %v651_v36  ;;  %2946 = vmatpush.msk.msra.mxu1 %vm401_vm1, %v657_v35  ;;  %v987_v54 = vpop.permute.xlu2 %986 }
  0xb6   : > { %2948 = vmatpush.msk.msra.mxu2 %vm401_vm1, %v656_v39  ;;  %2950 = vmatpush.msk.msra.mxu3 %vm401_vm1, %v655_v38 }
  0xb7   : > { %2944 = vmatmul.msk.f32.vlgmr.msra.gmra.mxu0 %vm397_vm2, %v2938_v32  ;;  %2947 = vmatmul.msk.f32.vlgmr.msra.gmra.mxu1 %vm397_vm2, %v2945_v37 }
  0xb8   : > { %2949 = vmatmul.msk.f32.vlgmr.msra.gmra.mxu2 %vm397_vm2, %v2945_v37  ;;  %2951 = vmatmul.msk.f32.vlgmr.msra.gmra.mxu3 %vm397_vm2, %v2945_v37 }
  0xb9   : > { %2955 = vmatpush.msk.msrb.mxu1 %vm401_vm1, %v3404_v5  ;;  %2957 = vmatpush.msk.msrb.mxu2 %vm401_vm1, %v3412_v7 }
  0xbb   : > { %v813_v41 = vpop.permute.xlu0 %812 }
  0xbc   : > { %v815_v42 = vpop.permute.xlu1 %814 }
  0xbd   : > { %v820_v44 = vsel %vm818_vm6, %v813_v41, %v815_v42  ;;  %v1076_v62 = vpop.permute.xlu2 %1075 }
  0xbe   : > { %2960 = vmatpush.msk.msrb.mxu3 %vm401_vm1, %v820_v44 }
  0xbf   : > { %2954 = vmatmul.msk.f32.vlgmr.msrb.gmra.mxu0 %vm397_vm2, %v2952_v43  ;;  %2956 = vmatmul.msk.f32.vlgmr.msrb.gmra.mxu1 %vm397_vm2, %v2952_v43 }
  0xc0   : > { %2958 = vmatmul.msk.f32.vlgmr.msrb.gmra.mxu2 %vm397_vm2, %v2952_v43  ;;  %2961 = vmatmul.msk.f32.vlgmr.msrb.gmra.mxu3 %vm397_vm2, %v2959_v45 }
  0xc3   : > { %v902_v47 = vpop.permute.xlu0 %901 }
  0xc4   : > { %v906_v48 = vsel %vm905_vm7, %v902_v47, %v904_v46  ;;  %v907_v49 = vsel %vm905_vm7, %v900_v40, %v902_v47  ;;  %v817_v50 = vpop.permute.xlu1 %816 }
  0xc5   : > { %v819_v51 = vsel %vm818_vm6, %v815_v42, %v817_v50  ;;  %v821_v52 = vsel %vm818_vm6, %v817_v50, %v813_v41  ;;  %2967 = vmatpush.msk.msra.mxu2 %vm401_vm1, %v907_v49  ;;  %2969 = vmatpush.msk.msra.mxu3 %vm401_vm1, %v906_v48  ;;  %v358_v48 = vld [vmem:[%s4155_s1] sm:$0x7] }
  0xc6   : > { %2962 = vmatpush.msk.msra.mxu0 %vm401_vm1, %v819_v51  ;;  %2964 = vmatpush.msk.msra.mxu1 %vm401_vm1, %v821_v52 }
  0xc7   : > { %2963 = vmatmul.msk.f32.vlgmr.msra.gmra.mxu0 %vm397_vm2, %v2959_v45  ;;  %2965 = vmatmul.msk.f32.vlgmr.msra.gmra.mxu1 %vm397_vm2, %v2959_v45 }
  0xc8   : > { %2968 = vmatmul.msk.f32.vlgmr.msra.gmra.mxu2 %vm397_vm2, %v2966_v53  ;;  %2970 = vmatmul.msk.f32.vlgmr.msra.gmra.mxu3 %vm397_vm2, %v2966_v53 }
  0xc9   : > { %2971 = vmatpush.msk.msrb.mxu0 %vm401_vm1, %v908_v55  ;;  %v3606_v55 = vperm.slane %v358_v48, 0 }
  0xcb   : > { %v989_v56 = vpop.permute.xlu0 %988 }
  0xcc   : > { %v994_v57 = vsel %vm992_vm8, %v987_v54, %v989_v56  ;;  %v991_v58 = vpop.permute.xlu1 %990 }
  0xcd   : > { %v993_v60 = vsel %vm992_vm8, %v989_v56, %v991_v58  ;;  %v995_v61 = vsel %vm992_vm8, %v991_v58, %v987_v54  ;;  %2974 = vmatpush.msk.msrb.mxu1 %vm401_vm1, %v994_v57  ;;  %v3608_v58 = vperm.slane %v358_v48, 1 }
  0xce   : > { %2976 = vmatpush.msk.msrb.mxu2 %vm401_vm1, %v993_v60  ;;  %2978 = vmatpush.msk.msrb.mxu3 %vm401_vm1, %v995_v61 }
  0xcf   : > { %2972 = vmatmul.msk.f32.vlgmr.msrb.gmra.mxu0 %vm397_vm2, %v2966_v53  ;;  %2975 = vmatmul.msk.f32.vlgmr.msrb.gmra.mxu1 %vm397_vm2, %v2973_v59 }
  0xd0   : > { %2977 = vmatmul.msk.f32.vlgmr.msrb.gmra.mxu2 %vm397_vm2, %v2973_v59  ;;  %2979 = vmatmul.msk.f32.vlgmr.msrb.gmra.mxu3 %vm397_vm2, %v2973_v59 }
  0xd3   : > { %v1074_v63 = vpop.permute.xlu0 %1073 }
  0xd4   : > { %v1081_v0 = vsel %vm1079_vm9, %v1074_v63, %v1076_v62  ;;  %v1078_v1 = vpop.permute.xlu1 %1077 }
  0xd5   : > { %v1080_v3 = vsel %vm1079_vm9, %v1076_v62, %v1078_v1  ;;  %v1082_v4 = vsel %vm1079_vm9, %v1078_v1, %v1074_v63  ;;  %2981 = vmatpush.msk.msra.mxu0 %vm401_vm1, %v1081_v0 }
  0xd6   : > { %2983 = vmatpush.msk.msra.mxu1 %vm401_vm1, %v1080_v3  ;;  %2985 = vmatpush.msk.msra.mxu2 %vm401_vm1, %v1082_v4 }
  0xd7   : > { %2982 = vmatmul.msk.f32.vlgmr.msra.gmra.mxu0 %vm397_vm2, %v2980_v2  ;;  %2984 = vmatmul.msk.f32.vlgmr.msra.gmra.mxu1 %vm397_vm2, %v2980_v2 }
  0xd8   : > { %2986 = vmatmul.msk.f32.vlgmr.msra.gmra.mxu2 %vm397_vm2, %v2980_v2 }
  0xdb   : > { %v382_v16 = vpop.permute.xlu0 %381 }
 0x11c   : > { %v448_v5 = vpop.f32.mrf.mxu1 }
 0x11d   : > { %v472_v22 = vadd.f32 %v448_v5, %v382_v16 }
 0x123   : > { %v428_v6 = vpop.f32.mrf.mxu0 }
 0x124   : > { %v471_v21 = vadd.f32 %v428_v6, %v382_v16  ;;  %v3612_v6 = vperm.slane %v358_v48, 2 }
 0x12a   : > { %v468_v7 = vpop.f32.mrf.mxu2  ;;  %v515_v8 = vpop.f32.mrf.mxu3 }
 0x12b   : > { %v558_v23 = vadd.f32 %v515_v8, %v471_v21  ;;  %v473_v30 = vadd.f32 %v468_v7, %v382_v16 }
 0x12c   : > { %v535_v9 = vpop.f32.mrf.mxu0  ;;  %v555_v11 = vpop.f32.mrf.mxu1 }
 0x12d   : > { %v559_v26 = vadd.f32 %v535_v9, %v472_v22  ;;  %v560_v36 = vadd.f32 %v555_v11, %v473_v30 }
 0x133   : > { %v602_v12 = vpop.f32.mrf.mxu2  ;;  %v622_v13 = vpop.f32.mrf.mxu3 }
 0x134   : > { %v642_v14 = vpop.f32.mrf.mxu0  ;;  %v689_v15 = vpop.f32.mrf.mxu1  ;;  %v645_v29 = vadd.f32 %v602_v12, %v558_v23  ;;  %v646_v31 = vadd.f32 %v622_v13, %v559_v26 }
 0x135   : > { %v647_v41 = vadd.f32 %v642_v14, %v560_v36  ;;  %v2990_v36 = vld [vmem:[%s4158_s4 + $0x4] sm:$0xf] }
 0x136   : > { %v732_v32 = vadd.f32 %v689_v15, %v645_v29 }
 0x13b   : > { %v709_v17 = vpop.f32.mrf.mxu2  ;;  %v729_v18 = vpop.f32.mrf.mxu3 }
 0x13c   : > { %v766_v19 = vpop.f32.mrf.mxu0  ;;  %v786_v20 = vpop.f32.mrf.mxu1  ;;  %v733_v33 = vadd.f32 %v709_v17, %v646_v31  ;;  %v734_v44 = vadd.f32 %v729_v18, %v647_v41  ;;  %v1188_v17 = vld [vmem:[%s4159_s5] sm:$0xf] }
 0x13d   : > { %v809_v34 = vadd.f32 %v766_v19, %v732_v32 }
 0x13e   : > { %v810_v42 = vadd.f32 %v786_v20, %v733_v33 }
 0x143   : > { %v806_v24 = vpop.f32.mrf.mxu2  ;;  %v853_v25 = vpop.f32.mrf.mxu3 }
 0x144   : > { %v873_v27 = vpop.f32.mrf.mxu0  ;;  %v893_v28 = vpop.f32.mrf.mxu1  ;;  %v896_v39 = vadd.f32 %v853_v25, %v809_v34  ;;  %v811_v46 = vadd.f32 %v806_v24, %v734_v44  ;;  %v1203_v24 = vld [vmem:[%s4158_s4] sm:$0xf] }
 0x145   : > { %v897_v45 = vadd.f32 %v873_v27, %v810_v42 }
 0x146   : > { %v898_v56 = vadd.f32 %v893_v28, %v811_v46 }
 0x14b   : > { %v940_v35 = vpop.f32.mrf.mxu2  ;;  %v960_v40 = vpop.f32.mrf.mxu3 }
 0x14c   : > { %v980_v37 = vpop.f32.mrf.mxu0  ;;  %v1027_v38 = vpop.f32.mrf.mxu1  ;;  %v983_v43 = vadd.f32 %v940_v35, %v896_v39  ;;  %v984_v47 = vadd.f32 %v960_v40, %v897_v45  ;;  %v2994_v45 = vld [vmem:[%s4158_s4 + $0x8] sm:$0xf] }
 0x14d   : > { %v985_v61 = vadd.f32 %v980_v37, %v898_v56 }
 0x14e   : > { %v1070_v49 = vadd.f32 %v1027_v38, %v983_v43 }
 0x153   : > { %v1047_v50 = vpop.f32.mrf.mxu2  ;;  %v1067_v59 = vpop.f32.mrf.mxu3 }
 0x154   : > { %v1071_v51 = vadd.f32 %v1047_v50, %v984_v47  ;;  %v1114_v52 = vpop.f32.mrf.mxu0  ;;  %v1134_v53 = vpop.f32.mrf.mxu1  ;;  %v1072_v0 = vadd.f32 %v1067_v59, %v985_v61  ;;  %v2998_v50 = vld [vmem:[%s4158_s4 + $0xc] sm:$0xf] }
 0x155   : > { %v1157_v54 = vadd.f32 %v1114_v52, %v1070_v49 }
 0x156   : > { %v1158_v57 = vadd.f32 %v1134_v53, %v1071_v51 }
 0x157   : > { %v1160_v60 = vmax.f32 %v1157_v54, 0.0 }
 0x158   : > { %v1161_v62 = vmax.f32 %v1158_v57, 0.0 }
 0x159   : > { %v1170_v63 = vmul.f32 %v3606_v55, %v1160_v60 }
 0x15a   : > { %v1171_v1 = vmul.f32 %v3608_v58, %v1161_v62 }
 0x15b   : > { %v1176_v2 = vrot.slane %v1170_v63, 4  ;;  %v1154_v3 = vpop.f32.mrf.mxu2 }
 0x15c   : > { %v1177_v4 = vrot.slane %v1171_v1, 4  ;;  %v1159_v5 = vadd.f32 %v1154_v3, %v1072_v0  ;;  %v3002_v1 = vld [vmem:[%s4158_s4 + $0x10] sm:$0xf] }
 0x15d   : > { %1182 = vst [vmem:[#allocation2 + $0x28] sm:$0xf0] %v1176_v2 }
 0x15e   : > { %1183 = vst [vmem:[#allocation2 + $0x10] sm:$0xf0] %v1177_v4  ;;  %v1162_v7 = vmax.f32 %v1159_v5, 0.0 }
 0x160   : > { %v1172_v8 = vmul.f32 %v3612_v6, %v1162_v7 }
 0x162   : > { %v1178_v9 = vrot.slane %v1172_v8, 4 }
 0x164   : > { %1184 = vst [vmem:[#allocation2 + $0x8] sm:$0xf0] %v1178_v9  ;;  %v3619_v12 = vld [vmem:[#allocation2 + $0x28] sm:$0xff] }
 0x165   : > { %v3615_v11 = vld [vmem:[#allocation2 + $0x10] sm:$0xff] }
 0x166   : > { %1196 = vrot.lane.b32.xlu2 %v3615_v11, %s3287_s30  ;;  %v3636_v16 = vpack.i.bf16 %v3615_v11, %v3619_v12 }
 0x16b   : > { %v3621_v13 = vld [vmem:[#allocation2 + $0x8] sm:$0xff] }
 0x16c   : > { %v3142_v14 = vpack.i.bf16 %v3621_v13, %v3619_v12  ;;  %v3627_v15 = vpack.i.bf16 %v3621_v13, %v3615_v11 }
 0x16e   : > { %3143 = vrot.lane.b32.xlu1 %v3142_v14, %s3287_s30  ;;  %3153 = vrot.lane.b32.xlu0 %v3627_v15, %s3289_s12 }
 0x16f   : > { %1275 = vrot.lane.b32.xlu2 %v3621_v13, %s3288_s11 }
 0x176   : > { %1427 = vrot.lane.b32.xlu0 %v3615_v11, %s3290_s18  ;;  %3148 = vrot.lane.b32.xlu1 %v3636_v16, %s3288_s11 }
 0x177   : > { %3158 = vrot.lane.b32.xlu2 %v3142_v14, %s3290_s18 }
 0x17e   : > { %3173 = vrot.lane.b32.xlu0 %v3142_v14, %s4167_s21  ;;  %1348 = vrot.lane.b32.xlu1 %v3619_v12, %s3289_s12 }
 0x17f   : > { %1570 = vrot.lane.b32.xlu2 %v3619_v12, %s3291_s20 }
 0x186   : > { %3178 = vrot.lane.b32.xlu0 %v3636_v16, %s3294_s26  ;;  %3163 = vrot.lane.b32.xlu1 %v3627_v15, %s3291_s20 }
 0x187   : > { %3168 = vrot.lane.b32.xlu2 %v3636_v16, %s4171_s28 }
 0x18e   : > { %1191 = vperm.xlu0 %3141, %v1188_v17   ;;  %1649 = vrot.lane.b32.xlu1 %v3615_v11, %s4167_s21  ;;  %v3006_v17 = vld [vmem:[%s4158_s4 + $0x14] sm:$0xf] }
 0x18f   : > { %1805 = vrot.lane.b32.xlu2 %v3621_v13, %s3294_s26 }
 0x196   : > { %3183 = vrot.lane.b32.xlu0 %v3636_v16, %s3287_s30  ;;  %1728 = vrot.lane.b32.xlu1 %v3621_v13, %s4171_s28 }
 0x197   : > { %2188 = vrot.lane.b32.xlu2 %v3615_v11, %s3290_s18 }
 0x19e   : > { %1994 = vrot.lane.b32.xlu0 %v3619_v12, %s3288_s11  ;;  %1907 = vrot.lane.b32.xlu1 %v3621_v13, %s3287_s30 }
 0x19f   : > { %3188 = vrot.lane.b32.xlu2 %v3627_v15, %s3288_s11 }
 0x1a6   : > { %2093 = vrot.lane.b32.xlu0 %v3615_v11, %s3289_s12  ;;  %3198 = vrot.lane.b32.xlu1 %v3142_v14, %s3289_s12 }
 0x1a7   : > { %3203 = vrot.lane.b32.xlu2 %v3142_v14, %s3291_s20 }
 0x1ae   : > { %3193 = vrot.lane.b32.xlu0 %v3142_v14, %s3290_s18 }
 0x1c0   : > { %v1197_v18 = vpop.permute.xlu2 %1196 }
 0x1c9   : > { %v1276_v19 = vpop.permute.xlu2 %1275 }
 0x1d1   : > { %v3159_v25 = vpop.permute.xlu2 %3158 }
 0x1d2   : > { %v3161_v32 = vunpack.i.h.bf16 %v3159_v25  ;;  %v3160_v33 = vunpack.i.l.bf16 %v3159_v25 }
 0x1d4   : > { %v1433_v43 = vsel %vm654_vm5, %v3161_v32, %v3160_v33 }
 0x1d9   : > { %v1571_v41 = vpop.permute.xlu2 %1570 }
 0x1e0   : > { %v3144_v20 = vpop.permute.xlu1 %3143  ;;  %v3154_v23 = vpop.permute.xlu0 %3153 }
 0x1e1   : > { %v3146_v21 = vunpack.i.h.bf16 %v3144_v20  ;;  %v3145_v22 = vunpack.i.l.bf16 %v3144_v20  ;;  %v3156_v34 = vunpack.i.h.bf16 %v3154_v23  ;;  %v3155_v35 = vunpack.i.l.bf16 %v3154_v23  ;;  %v3169_v52 = vpop.permute.xlu2 %3168 }
 0x1e2   : > { %v3171_v57 = vunpack.i.h.bf16 %v3169_v52  ;;  %v3170_v59 = vunpack.i.l.bf16 %v3169_v52 }
 0x1e3   : > { %v1202_v26 = vsel %vm392_vm0, %v3146_v21, %v3145_v22  ;;  %v1201_v27 = vsel %vm392_vm0, %v3145_v22, %v1197_v18  ;;  %v1200_v28 = vsel %vm392_vm0, %v1197_v18, %v3146_v21  ;;  %v1354_v42 = vsel %vm567_vm4, %v3155_v35, %v3156_v34  ;;  %v3010_v22 = vld [vmem:[%s4158_s4 + $0x18] sm:$0xf] }
 0x1e4   : > { %1223 = vmatpush.msra.mxu3 %v1202_v26  ;;  %1243 = vmatpush.msrb.mxu0 %v1201_v27  ;;  %v1731_v3 = vsel %vm992_vm8, %v3170_v59, %v3171_v57  ;;  %v3014_v26 = vld [vmem:[%s4158_s4 + $0x1c] sm:$0xf]  ;;  %v3018_v27 = vld [vmem:[%s4158_s4 + $0x20] sm:$0xf] }
 0x1e5   : > { %1263 = vmatpush.msrb.mxu1 %v1200_v28  ;;  %2987 = vmatmul.msk.f32.vlgmr.msra.gmra.mxu3 %vm1204_vm10, %v1203_v24 }
 0x1e6   : > { %2988 = vmatmul.msk.f32.vlgmr.msrb.gmra.mxu0 %vm1204_vm10, %v1203_v24  ;;  %2989 = vmatmul.msk.f32.vlgmr.msrb.gmra.mxu1 %vm1204_vm10, %v1203_v24 }
 0x1e8   : > { %v3149_v29 = vpop.permute.xlu1 %3148  ;;  %v1428_v37 = vpop.permute.xlu0 %1427 }
 0x1e9   : > { %v3151_v30 = vunpack.i.h.bf16 %v3149_v29  ;;  %v3150_v31 = vunpack.i.l.bf16 %v3149_v29  ;;  %v1431_v48 = vsel %vm654_vm5, %v1428_v37, %v3161_v32  ;;  %v1432_v49 = vsel %vm654_vm5, %v3160_v33, %v1428_v37  ;;  %v1806_v18 = vpop.permute.xlu2 %1805 }
 0x1eb   : > { %v1279_v38 = vsel %vm480_vm3, %v1276_v19, %v3150_v31  ;;  %v1278_v39 = vsel %vm480_vm3, %v3150_v31, %v3151_v30  ;;  %v1277_v40 = vsel %vm480_vm3, %v3151_v30, %v1276_v19 }
 0x1ec   : > { %1300 = vmatpush.msrb.mxu2 %v1279_v38  ;;  %1320 = vmatpush.msrb.mxu3 %v1278_v39 }
 0x1ed   : > { %1340 = vmatpush.msra.mxu0 %v1277_v40  ;;  %2991 = vmatmul.msk.f32.vlgmr.msrb.gmra.mxu2 %vm1204_vm10, %v2990_v36 }
 0x1ee   : > { %2992 = vmatmul.msk.f32.vlgmr.msrb.gmra.mxu3 %vm1204_vm10, %v2990_v36  ;;  %2993 = vmatmul.msk.f32.vlgmr.msra.gmra.mxu0 %vm1204_vm10, %v2990_v36 }
 0x1ef   : > { %1417 = vmatpush.msra.mxu3 %v1354_v42  ;;  %1454 = vmatpush.msrb.mxu0 %v1433_v43 }
 0x1f0   : > { %v1349_v44 = vpop.permute.xlu1 %1348  ;;  %v3174_v51 = vpop.permute.xlu0 %3173 }
 0x1f1   : > { %1522 = vmatpush.msrb.mxu3 %v3619_v12  ;;  %1542 = vmatpush.msra.mxu0 %v3615_v11  ;;  %v1355_v46 = vsel %vm567_vm4, %v1349_v44, %v3155_v35  ;;  %v1356_v47 = vsel %vm567_vm4, %v3156_v34, %v1349_v44  ;;  %v3176_v60 = vunpack.i.h.bf16 %v3174_v51  ;;  %v3175_v61 = vunpack.i.l.bf16 %v3174_v51 }
 0x1f2   : > { %1377 = vmatpush.msra.mxu1 %v1356_v47  ;;  %1397 = vmatpush.msra.mxu2 %v1355_v46 }
 0x1f3   : > { %2995 = vmatmul.msk.f32.vlgmr.msra.gmra.mxu1 %vm1204_vm10, %v2994_v45  ;;  %v1655_v2 = vsel %vm905_vm7, %v3176_v60, %v3175_v61 }
 0x1f4   : > { %1494 = vmatpush.msrb.mxu2 %v1431_v48  ;;  %1474 = vmatpush.msrb.mxu1 %v1432_v49 }
 0x1f5   : > { %2996 = vmatmul.msk.f32.vlgmr.msra.gmra.mxu2 %vm1204_vm10, %v2994_v45 }
 0x1f6   : > { %1562 = vmatpush.msra.mxu1 %v3621_v13  ;;  %2997 = vmatmul.msk.f32.vlgmr.msra.gmra.mxu3 %vm1204_vm10, %v2994_v45 }
 0x1f7   : > { %2999 = vmatmul.msk.f32.vlgmr.msrb.gmra.mxu0 %vm1204_vm10, %v2998_v50 }
 0x1f8   : > { %v3164_v53 = vpop.permute.xlu1 %3163  ;;  %v3179_v4 = vpop.permute.xlu0 %3178 }
 0x1f9   : > { %v3166_v54 = vunpack.i.h.bf16 %v3164_v53  ;;  %v3165_v56 = vunpack.i.l.bf16 %v3164_v53  ;;  %v3181_v9 = vunpack.i.h.bf16 %v3179_v4  ;;  %v3180_v14 = vunpack.i.l.bf16 %v3179_v4 }
 0x1fb   : > { %3000 = vmatmul.msk.f32.vlgmr.msrb.gmra.mxu1 %vm1204_vm10, %v2998_v50  ;;  %v1577_v62 = vsel %vm818_vm6, %v1571_v41, %v3165_v56  ;;  %v1576_v63 = vsel %vm818_vm6, %v3165_v56, %v3166_v54  ;;  %v1578_v0 = vsel %vm818_vm6, %v3166_v54, %v1571_v41  ;;  %v1808_v19 = vsel %vm1079_vm9, %v3180_v14, %v3181_v9 }
 0x1fc   : > { %1599 = vmatpush.msra.mxu2 %v1577_v62  ;;  %1619 = vmatpush.msra.mxu3 %v1576_v63  ;;  %v1807_v20 = vsel %vm1079_vm9, %v3181_v9, %v1806_v18  ;;  %v1809_v25 = vsel %vm1079_vm9, %v1806_v18, %v3180_v14 }
 0x1fd   : > { %1639 = vmatpush.msrb.mxu0 %v1578_v0  ;;  %3001 = vmatmul.msk.f32.vlgmr.msrb.gmra.mxu2 %vm1204_vm10, %v2998_v50 }
 0x1fe   : > { %3003 = vmatmul.msk.f32.vlgmr.msrb.gmra.mxu3 %vm1204_vm10, %v3002_v1 }
 0x1ff   : > { %3004 = vmatmul.msk.f32.vlgmr.msra.gmra.mxu0 %vm1204_vm10, %v3002_v1  ;;  %1716 = vmatpush.msrb.mxu3 %v1655_v2 }
 0x200   : > { %1753 = vmatpush.msra.mxu0 %v1731_v3  ;;  %v1650_v5 = vpop.permute.xlu1 %1649  ;;  %v1192_v40 = vpop.permute.xlu0 %1191 }
 0x201   : > { %v1653_v7 = vsel %vm905_vm7, %v1650_v5, %v3176_v60  ;;  %v1654_v8 = vsel %vm905_vm7, %v3175_v61, %v1650_v5 }
 0x202   : > { %1676 = vmatpush.msrb.mxu1 %v1654_v8  ;;  %1696 = vmatpush.msrb.mxu2 %v1653_v7 }
 0x203   : > { %3005 = vmatmul.msk.f32.vlgmr.msra.gmra.mxu1 %vm1204_vm10, %v3002_v1 }
 0x205   : > { %3007 = vmatmul.msk.f32.vlgmr.msra.gmra.mxu2 %vm1204_vm10, %v3006_v17 }
 0x206   : > { %3008 = vmatmul.msk.f32.vlgmr.msra.gmra.mxu3 %vm1204_vm10, %v3006_v17 }
 0x207   : > { %3009 = vmatmul.msk.f32.vlgmr.msrb.gmra.mxu0 %vm1204_vm10, %v3006_v17  ;;  %1830 = vmatpush.msra.mxu3 %v1808_v19 }
 0x208   : > { %1850 = vmatpush.msrb.mxu0 %v1807_v20  ;;  %v1729_v21 = vpop.permute.xlu1 %1728 }
 0x209   : > { %v1730_v23 = vsel %vm992_vm8, %v3171_v57, %v1729_v21  ;;  %v1732_v24 = vsel %vm992_vm8, %v1729_v21, %v3170_v59 }
 0x20a   : > { %1773 = vmatpush.msra.mxu1 %v1730_v23  ;;  %1793 = vmatpush.msra.mxu2 %v1732_v24 }
 0x20b   : > { %3011 = vmatmul.msk.f32.vlgmr.msrb.gmra.mxu1 %vm1204_vm10, %v3010_v22 }
 0x20c   : > { %1870 = vmatpush.msrb.mxu1 %v1809_v25 }
 0x20d   : > { %3012 = vmatmul.msk.f32.vlgmr.msrb.gmra.mxu2 %vm1204_vm10, %v3010_v22 }
 0x20e   : > { %3013 = vmatmul.msk.f32.vlgmr.msrb.gmra.mxu3 %vm1204_vm10, %v3010_v22 }
 0x20f   : > { %3015 = vmatmul.msk.f32.vlgmr.msra.gmra.mxu0 %vm1204_vm10, %v3014_v26 }
 0x213   : > { %3016 = vmatmul.msk.f32.vlgmr.msra.gmra.mxu1 %vm1204_vm10, %v3014_v26 }
 0x215   : > { %3017 = vmatmul.msk.f32.vlgmr.msra.gmra.mxu2 %vm1204_vm10, %v3014_v26 }
 0x216   : > { %3019 = vmatmul.msk.f32.vlgmr.msra.gmra.mxu3 %vm1204_vm10, %v3018_v27 }
 0x217   : > { %3020 = vmatmul.msk.f32.vlgmr.msrb.gmra.mxu0 %vm1204_vm10, %v3018_v27 }
 0x21b   : > { %3021 = vmatmul.msk.f32.vlgmr.msrb.gmra.mxu1 %vm1204_vm10, %v3018_v27 }
 0x263   : > { %v1245_v28 = vpop.f32.mrf.mxu0  ;;  %v1265_v29 = vpop.f32.mrf.mxu1 }
 0x264   : > { %v1269_v43 = vadd.f32 %v1245_v28, %v1192_v40  ;;  %v1270_v50 = vadd.f32 %v1265_v29, %v1192_v40 }
 0x268   : > { %v1225_v30 = vpop.f32.mrf.mxu3 }
 0x269   : > { %v1268_v45 = vadd.f32 %v1225_v30, %v1192_v40 }
 0x26b   : > { %v1342_v31 = vpop.f32.mrf.mxu0 }
 0x26c   : > { %v1347_v54 = vadd.f32 %v1342_v31, %v1270_v50 }
 0x270   : > { %v1302_v32 = vpop.f32.mrf.mxu2  ;;  %v1379_v33 = vpop.f32.mrf.mxu1 }
 0x271   : > { %v1322_v34 = vpop.f32.mrf.mxu3  ;;  %v1345_v48 = vadd.f32 %v1302_v32, %v1268_v45 }
 0x272   : > { %v1346_v46 = vadd.f32 %v1322_v34, %v1269_v43  ;;  %v1908_v43 = vpop.permute.xlu1 %1907 }
 0x273   : > { %v1422_v51 = vadd.f32 %v1379_v33, %v1345_v48 }
 0x274   : > { %v1456_v35 = vpop.f32.mrf.mxu0 }
 0x275   : > { %v1499_v61 = vadd.f32 %v1456_v35, %v1422_v51 }
 0x278   : > { %v1399_v36 = vpop.f32.mrf.mxu2  ;;  %v1476_v37 = vpop.f32.mrf.mxu1 }
 0x279   : > { %v1419_v38 = vpop.f32.mrf.mxu3  ;;  %v1423_v49 = vadd.f32 %v1399_v36, %v1346_v46 }
 0x27a   : > { %v1424_v59 = vadd.f32 %v1419_v38, %v1347_v54  ;;  %v3865_v46 = vpop.permute.xlu1 %3198 }
 0x27b   : > { %v1500_v56 = vadd.f32 %v1476_v37, %v1423_v49  ;;  %v3840_v37 = vpop.permute.xlu2 %2188 }
 0x27c   : > { %v1544_v39 = vpop.f32.mrf.mxu0 }
 0x27d   : > { %v1568_v62 = vadd.f32 %v1544_v39, %v1500_v56  ;;  %v3184_v39 = vpop.permute.xlu0 %3183 }
 0x280   : > { %v1496_v41 = vpop.f32.mrf.mxu2  ;;  %v1564_v42 = vpop.f32.mrf.mxu1 }
 0x281   : > { %v1524_v44 = vpop.f32.mrf.mxu3  ;;  %v1501_v63 = vadd.f32 %v1496_v41, %v1424_v59  ;;  %v1917_v59 = vld [vmem:[%s4160_s6] sm:$0xf] }
 0x282   : > { %v1567_v0 = vadd.f32 %v1524_v44, %v1499_v61 }
 0x283   : > { %v1569_v5 = vadd.f32 %v1564_v42, %v1501_v63  ;;  %v3853_v38 = vpop.permute.xlu2 %3188 }
 0x284   : > { %v1641_v47 = vpop.f32.mrf.mxu0 }
 0x285   : > { %v1646_v18 = vadd.f32 %v1641_v47, %v1569_v5  ;;  %v1995_v41 = vpop.permute.xlu0 %1994 }
 0x288   : > { %v1601_v52 = vpop.f32.mrf.mxu2  ;;  %v1678_v53 = vpop.f32.mrf.mxu1 }
 0x289   : > { %v1621_v57 = vpop.f32.mrf.mxu3  ;;  %v1644_v2 = vadd.f32 %v1601_v52, %v1567_v0  ;;  %v3028_v0 = vld [vmem:[%s4160_s6 + $0x4] sm:$0xf] }
 0x28a   : > { %v1645_v1 = vadd.f32 %v1621_v57, %v1568_v62  ;;  %v3191_v62 = vunpack.i.h.bf16 %v3853_v38 }
 0x28b   : > { %v1721_v17 = vadd.f32 %v1678_v53, %v1644_v2  ;;  %v3859_v40 = vpop.permute.xlu2 %3203  ;;  %v3186_v53 = vunpack.i.h.bf16 %v3184_v39 }
 0x28c   : > { %v1755_v60 = vpop.f32.mrf.mxu0 }
 0x28d   : > { %v1798_v22 = vadd.f32 %v1755_v60, %v1721_v17  ;;  %v3863_v44 = vpop.permute.xlu0 %2093  ;;  %v1911_v57 = vsel %vm392_vm0, %v3186_v53, %v1908_v43 }
 0x290   : > { %v1698_v3 = vpop.f32.mrf.mxu2  ;;  %v1775_v4 = vpop.f32.mrf.mxu1 }
 0x291   : > { %v1722_v7 = vadd.f32 %v1698_v3, %v1645_v1  ;;  %v1718_v8 = vpop.f32.mrf.mxu3  ;;  %v2010_v1 = vsel %vm480_vm3, %v3191_v62, %v1995_v41  ;;  %v3185_v3 = vunpack.i.l.bf16 %v3184_v39 }
 0x292   : > { %v1723_v20 = vadd.f32 %v1718_v8, %v1646_v18 }
 0x293   : > { %v1799_v9 = vadd.f32 %v1775_v4, %v1722_v7  ;;  %v1913_v17 = vsel %vm392_vm0, %v3185_v3, %v3186_v53  ;;  %v1893_v53 = vld [vmem:[%s4161_s7] sm:$0xf] }
 0x294   : > { %v1852_v14 = vpop.f32.mrf.mxu0 }
 0x295   : > { %v1876_v19 = vadd.f32 %v1852_v14, %v1799_v9  ;;  %v3867_v47 = vpop.permute.xlu0 %3193  ;;  %v3190_v9 = vunpack.i.l.bf16 %v3853_v38  ;;  %v1915_v14 = vsel %vm392_vm0, %v1908_v43, %v3185_v3  ;;  %v3205_v43 = vunpack.i.l.bf16 %v3859_v40 }
 0x297   : > { %v1879_v21 = vmax.f32 %v1876_v19, 0.0 }
 0x298   : > { %v1795_v23 = vpop.f32.mrf.mxu2  ;;  %v1872_v24 = vpop.f32.mrf.mxu1 }
 0x299   : > { %v1882_v25 = vmul.f32 %v1879_v21, %v3608_v58  ;;  %v1800_v26 = vadd.f32 %v1795_v23, %v1723_v20  ;;  %v1832_v27 = vpop.f32.mrf.mxu3  ;;  %v3201_v20 = vunpack.i.h.bf16 %v3865_v46  ;;  %v3196_v21 = vunpack.i.h.bf16 %v3867_v47 }
 0x29a   : > { %v1875_v28 = vadd.f32 %v1832_v27, %v1798_v22  ;;  %v3195_v22 = vunpack.i.l.bf16 %v3867_v47 }
 0x29b   : > { %1885 = vst [vmem:[#allocation2 + $0x18] sm:$0xf] %v1882_v25  ;;  %v1877_v29 = vadd.f32 %v1872_v24, %v1800_v26  ;;  %v2008_v24 = vsel %vm480_vm3, %v1995_v41, %v3190_v9  ;;  %v2006_v25 = vsel %vm480_vm3, %v3190_v9, %v3191_v62  ;;  %v3042_v41 = vld [vmem:[%s4160_s6 + $0xc] sm:$0xf] }
 0x29c   : > { %v1878_v30 = vmax.f32 %v1875_v28, 0.0  ;;  %v2198_v47 = vsel %vm654_vm5, %v3195_v22, %v3840_v37 }
 0x29d   : > { %v1880_v31 = vmax.f32 %v1877_v29, 0.0 }
 0x29e   : > { %v1881_v32 = vmul.f32 %v1878_v30, %v3606_v55  ;;  %v2101_v30 = vsel %vm567_vm4, %v3863_v44, %v3201_v20 }
 0x29f   : > { %v1883_v33 = vmul.f32 %v1880_v31, %v3612_v6  ;;  %v2200_v31 = vsel %vm654_vm5, %v3196_v21, %v3195_v22  ;;  %v3070_v22 = vld [vmem:[%s4160_s6 + $0x1c] sm:$0xf] }
 0x2a0   : > { %1884 = vst [vmem:[#allocation2] sm:$0xf] %v1881_v32  ;;  %v3200_v32 = vunpack.i.l.bf16 %v3865_v46 }
 0x2a1   : > { %1886 = vst [vmem:[#allocation2 + $0x20] sm:$0xf] %v1883_v33 }
 0x2a2   : > { %v3786_v34 = vld [vmem:[#allocation2 + $0x18] sm:$0xf] }
 0x2a3   : > { %2362 = vrot.lane.b32.xlu0 %v3786_v34, %s3291_s20  ;;  %2190 = vrot.lane.b32.xlu1 %v3786_v34, %s3290_s18 }
 0x2a4   : > { %1905 = vrot.lane.b32.xlu2 %v3786_v34, %s3287_s30 }
 0x2a7   : > { %v3802_v36 = vld [vmem:[#allocation2] sm:$0xf] }
 0x2a8   : > { %v3794_v35 = vld [vmem:[#allocation2 + $0x20] sm:$0xf] }
 0x2ab   : > { %2004 = vrot.lane.b32.xlu0 %v3794_v35, %s3288_s11  ;;  %1909 = vrot.lane.b32.xlu1 %v3794_v35, %s3287_s30 }
 0x2ac   : > { %2000 = vrot.lane.b32.xlu2 %v3786_v34, %s3288_s11 }
 0x2b3   : > { %1996 = vrot.lane.b32.xlu0 %v3802_v36, %s3288_s11  ;;  %2366 = vrot.lane.b32.xlu1 %v3794_v35, %s3291_s20 }
 0x2b4   : > { %2095 = vrot.lane.b32.xlu2 %v3786_v34, %s3289_s12 }
 0x2bb   : > { %2360 = vrot.lane.b32.xlu0 %v3615_v11, %s3291_s20  ;;  %1901 = vrot.lane.b32.xlu1 %v3802_v36, %s3287_s30  ;;  %s4172_s30 = smov 111  }
 0x2bc   : > { %2194 = vrot.lane.b32.xlu2 %v3794_v35, %s3290_s18 }
 0x2c3   : > { %3208 = vrot.lane.b32.xlu0 %v3636_v16, %s4171_s28  ;;  %2186 = vrot.lane.b32.xlu1 %v3802_v36, %s3290_s18  ;;  %s350_s18 = sand.u32 1, %s3277_s14  }
 0x2c4   : > { %2099 = vrot.lane.b32.xlu2 %v3794_v35, %s3289_s12  ;;  %s3090_s21 = smul.u32 12, %s350_s18 }
 0x2c6   : > { %s352_s27 = scalar_lea.vmem [#allocation3], %s3090_s21 }
 0x2c7   : > { %s2858_s29 = sshll.u32 %s352_s27, 4  ;;  %s2859_s29 = int_to_ptr.vmem [resolvable:$true] %s2858_s29 }
 0x2cb   : > { %2358 = vrot.lane.b32.xlu0 %v3802_v36, %s3291_s20  ;;  %2091 = vrot.lane.b32.xlu1 %v3802_v36, %s3289_s12  ;;  %s3092_s20 = smul.u32 12, %s3372_s17 }
 0x2cc   : > { %2552 = vrot.lane.b32.xlu2 %v3786_v34, %s4171_s28 }
 0x2cd   : > { %s2856_s25 = scalar_lea.hbm %s4164_s10, %s3092_s20 }
 0x2ce   : > { %s2860_s17 = sshll.u32 %s2856_s25, 4  ;;  %s2861_s17 = int_to_ptr.hbm [resolvable:$true] %s2860_s17 }
 0x2cf   : > { %s3237_s11 = sshra.s32 %s2861_s17, 4  ;;  %s3238_s11 = int_to_ptr.hbm [resolvable:$true] %s3237_s11 }
 0x2d0   : > { %s3239_s12 = scalar_lea.hbm %s3238_s11, 12  ;;  %p3244_p0 = scmp.lt.s32.totalorder %s3238_s11, %s4164_s10 }
 0x2d1   : > { %p3240_p11 = scmp.ne.s32.totalorder %s3238_s11, %s3239_s12 }
 0x2d3   : > { %2647 = vrot.lane.b32.xlu0 %v3786_v34, %s3294_s26  ;;  %3213 = vrot.lane.b32.xlu1 %v3636_v16, %s4172_s30  ;;  %v2761_v16 = vld [vmem:[%s4163_s9] sm:$0xf]  ;;  %p3241_p12 = pnand %p3240_p11, %p3389_p5 }
 0x2d4   : > { %2457 = vrot.lane.b32.xlu2 %v3786_v34, %s4172_s30 }
 0x2d5   : > { %p3242_p13 = pneg %p3241_p12 }
 0x2db   : > { %2556 = vrot.lane.b32.xlu0 %v3794_v35, %s4171_s28  ;;  %2548 = vrot.lane.b32.xlu1 %v3802_v36, %s4171_s28 }
 0x2dc   : > { %2461 = vrot.lane.b32.xlu2 %v3794_v35, %s4172_s30 }
 0x2e3   : > { %2643 = vrot.lane.b32.xlu0 %v3802_v36, %s3294_s26  ;;  %2453 = vrot.lane.b32.xlu1 %v3802_v36, %s4172_s30 }
 0x2e4   : > { %2459 = vrot.lane.b32.xlu2 %v3621_v13, %s4172_s30  ;;  %s2845_s30 = scalar_lea.sflag [#allocation4], %s350_s18 }
 0x2eb   : > { %2764 = vperm.xlu0 %3141, %v2761_v16   ;;  %2651 = vrot.lane.b32.xlu1 %v3794_v35, %s3294_s26 }
 0x2ec   : > { %2554 = vrot.lane.b32.xlu2 %v3621_v13, %s4171_s28 }
 0x2f3   : > { %3218 = vrot.lane.b32.xlu1 %v3627_v15, %s3294_s26 }
 0x2f4   : > { %1896 = vperm.xlu2 %3222, %v1893_v53  }
 0x2fb   : > { %2641 = vrot.lane.b32.xlu1 %v3619_v12, %s3294_s26  ;;  %s3243_s26 = scalar_lea.hbm %s4164_s10, 24 }
 0x2fc   : > { %p3245_p1 = scmp.lt.s32.totalorder %s3243_s26, %s3239_s12 }
 0x2fe   : > { %v1906_v42 = vpop.permute.xlu2 %1905  ;;  %p3246_p2 = por %p3245_p1, %p3244_p0 }
 0x300   : > { %p3247_p3 = pnand %p3246_p2, %p3242_p13 }
 0x306   : > { %v2001_v45 = vpop.permute.xlu2 %2000 }
 0x30e   : > { %v3869_v48 = vpop.permute.xlu2 %2095 }
 0x315   : > { %v3871_v49 = vpop.permute.xlu0 %2362  ;;  %v3873_v15 = vpop.permute.xlu1 %2190 }
 0x316   : > { %v3875_v50 = vpop.permute.xlu2 %2194 }
 0x31d   : > { %v2005_v51 = vpop.permute.xlu0 %2004  ;;  %v1910_v52 = vpop.permute.xlu1 %1909 }
 0x31e   : > { %v1912_v54 = vsel %vm392_vm0, %v1906_v42, %v1910_v52  ;;  %v3880_v56 = vpop.permute.xlu2 %2099  ;;  %v2007_v18 = vsel %vm480_vm3, %v2001_v45, %v2005_v51 }
 0x31f   : > { %3026 = vmatpush.msk.msra.mxu0 %vm401_vm1, %v1912_v54  ;;  %v2102_v26 = vsel %vm567_vm4, %v3869_v48, %v3880_v56 }
 0x321   : > { %1986 = vmatpush.msra.mxu0 %v1911_v57  ;;  %v3049_v57 = vld [vmem:[%s4160_s6 + $0x10] sm:$0xf] }
 0x322   : > { %3027 = vmatmul.msk.f32.vlgmr.msra.gmra.mxu0 %vm1918_vm11, %v1917_v59 }
 0x325   : > { %v1997_v60 = vpop.permute.xlu0 %1996  ;;  %v3888_v61 = vpop.permute.xlu1 %2366 }
 0x326   : > { %v2011_v63 = vsel %vm480_vm3, %v2005_v51, %v1997_v60  ;;  %v3899_v2 = vpop.permute.xlu2 %2552  ;;  %v2009_v19 = vsel %vm480_vm3, %v1997_v60, %v2001_v45  ;;  %v2197_v45 = vsel %vm654_vm5, %v3873_v15, %v3875_v50 }
 0x327   : > { %3029 = vmatpush.msk.msra.mxu1 %vm401_vm1, %v2011_v63 }
 0x329   : > { %2041 = vmatpush.msra.mxu1 %v2010_v1  ;;  %v3056_v1 = vld [vmem:[%s4160_s6 + $0x14] sm:$0xf] }
 0x32a   : > { %3030 = vmatmul.msk.f32.vlgmr.msra.gmra.mxu1 %vm1918_vm11, %v3028_v0 }
 0x32d   : > { %v3902_v4 = vpop.permute.xlu0 %2360  ;;  %v1902_v5 = vpop.permute.xlu1 %1901 }
 0x32e   : > { %v1914_v7 = vsel %vm392_vm0, %v1902_v5, %v1906_v42  ;;  %v1916_v8 = vsel %vm392_vm0, %v1910_v52, %v1902_v5  ;;  %v3926_v23 = vpop.permute.xlu2 %2457  ;;  %v3206_v42 = vunpack.i.h.bf16 %v3859_v40  ;;  %v2369_v40 = vsel %vm818_vm6, %v3871_v49, %v3888_v61 }
 0x32f   : > { %3022 = vmatpush.msk.msrb.mxu2 %vm401_vm1, %v1916_v8  ;;  %3024 = vmatpush.msk.msrb.mxu3 %vm401_vm1, %v1914_v7 }
 0x330   : > { %v2368_v51 = vsel %vm818_vm6, %v3902_v4, %v3206_v42  ;;  %v2372_v52 = vsel %vm818_vm6, %v3206_v42, %v3205_v43 }
 0x331   : > { %1946 = vmatpush.msrb.mxu2 %v1915_v14  ;;  %1966 = vmatpush.msrb.mxu3 %v1913_v17 }
 0x332   : > { %3023 = vmatmul.msk.f32.vlgmr.msrb.gmra.mxu2 %vm1918_vm11, %v1917_v59  ;;  %3025 = vmatmul.msk.f32.vlgmr.msrb.gmra.mxu3 %vm1918_vm11, %v1917_v59 }
 0x333   : > { %3031 = vmatpush.msk.msra.mxu2 %vm401_vm1, %v2009_v19  ;;  %3033 = vmatpush.msk.msra.mxu3 %vm401_vm1, %v2007_v18  ;;  %v3063_v18 = vld [vmem:[%s4160_s6 + $0x18] sm:$0xf] }
 0x335   : > { %2061 = vmatpush.msra.mxu2 %v2008_v24  ;;  %2081 = vmatpush.msra.mxu3 %v2006_v25  ;;  %v3936_v27 = vpop.permute.xlu0 %3208  ;;  %v2187_v28 = vpop.permute.xlu1 %2186 }
 0x336   : > { %v2201_v29 = vsel %vm654_vm5, %v3875_v50, %v2187_v28 }
 0x337   : > { %3040 = vmatpush.msk.msrb.mxu2 %vm401_vm1, %v2102_v26  ;;  %3043 = vmatpush.msk.msrb.mxu3 %vm401_vm1, %v2201_v29 }
 0x339   : > { %2176 = vmatpush.msrb.mxu2 %v2101_v30  ;;  %2231 = vmatpush.msrb.mxu3 %v2200_v31  ;;  %v3077_v30 = vld [vmem:[%s4160_s6 + $0x20] sm:$0xf] }
 0x33a   : > { %3032 = vmatmul.msk.f32.vlgmr.msra.gmra.mxu2 %vm1918_vm11, %v3028_v0  ;;  %3034 = vmatmul.msk.f32.vlgmr.msra.gmra.mxu3 %vm1918_vm11, %v3028_v0 }
 0x33b   : > { %3050 = vmatpush.msk.msra.mxu2 %vm401_vm1, %v3802_v36  ;;  %3052 = vmatpush.msk.msra.mxu3 %vm401_vm1, %v3786_v34  ;;  %v3963_v36 = vpop.permute.xlu2 %2461  ;;  %v2103_v34 = vsel %vm567_vm4, %v3200_v32, %v3863_v44  ;;  %v2199_v44 = vsel %vm654_vm5, %v2187_v28, %v3873_v15 }
 0x33c   : > { %v2464_v60 = vsel %vm905_vm7, %v3926_v23, %v3963_v36 }
 0x33d   : > { %2308 = vmatpush.msra.mxu2 %v3619_v12  ;;  %2328 = vmatpush.msra.mxu3 %v3615_v11  ;;  %v2359_v33 = vpop.permute.xlu0 %2358  ;;  %v2092_v16 = vpop.permute.xlu1 %2091  ;;  %v3035_v11 = vld [vmem:[%s4160_s6 + $0x8] sm:$0xf]  ;;  %v2105_v12 = vsel %vm567_vm4, %v3201_v20, %v3200_v32 }
 0x33e   : > { %v2104_v38 = vsel %vm567_vm4, %v2092_v16, %v3869_v48  ;;  %v2106_v39 = vsel %vm567_vm4, %v3880_v56, %v2092_v16  ;;  %v2373_v46 = vsel %vm818_vm6, %v3888_v61, %v2359_v33  ;;  %v2196_v48 = vsel %vm654_vm5, %v3840_v37, %v3196_v21 }
 0x33f   : > { %3036 = vmatpush.msk.msrb.mxu0 %vm401_vm1, %v2106_v39  ;;  %3038 = vmatpush.msk.msrb.mxu1 %vm401_vm1, %v2104_v38  ;;  %v2371_v37 = vsel %vm818_vm6, %v2359_v33, %v3871_v49  ;;  %v2370_v56 = vsel %vm818_vm6, %v3205_v43, %v3902_v4  ;;  %v3210_v49 = vunpack.i.l.bf16 %v3936_v27 }
 0x341   : > { %2136 = vmatpush.msrb.mxu0 %v2105_v12  ;;  %2156 = vmatpush.msrb.mxu1 %v2103_v34 }
 0x342   : > { %3037 = vmatmul.msk.f32.vlgmr.msrb.gmra.mxu0 %vm1918_vm11, %v3035_v11  ;;  %3039 = vmatmul.msk.f32.vlgmr.msrb.gmra.mxu1 %vm1918_vm11, %v3035_v11 }
 0x343   : > { %3041 = vmatmul.msk.f32.vlgmr.msrb.gmra.mxu2 %vm1918_vm11, %v3035_v11  ;;  %3044 = vmatmul.msk.f32.vlgmr.msrb.gmra.mxu3 %vm1918_vm11, %v3042_v41  ;;  %v2460_v54 = vpop.permute.xlu2 %2459 }
 0x344   : > { %3045 = vmatpush.msk.msra.mxu0 %vm401_vm1, %v2199_v44  ;;  %3047 = vmatpush.msk.msra.mxu1 %vm401_vm1, %v2197_v45 }
 0x345   : > { %3059 = vmatpush.msk.msrb.mxu2 %vm401_vm1, %v2369_v40  ;;  %3061 = vmatpush.msk.msrb.mxu3 %vm401_vm1, %v2373_v46  ;;  %v4008_v15 = vpop.permute.xlu0 %2647  ;;  %v3214_v50 = vpop.permute.xlu1 %3213 }
 0x346   : > { %2251 = vmatpush.msra.mxu0 %v2198_v47  ;;  %2271 = vmatpush.msra.mxu1 %v2196_v48  ;;  %v3216_v59 = vunpack.i.h.bf16 %v3214_v50  ;;  %v3215_v4 = vunpack.i.l.bf16 %v3214_v50 }
 0x347   : > { %2423 = vmatpush.msrb.mxu2 %v2368_v51  ;;  %2443 = vmatpush.msrb.mxu3 %v2372_v52 }
 0x348   : > { %3054 = vmatpush.msk.msrb.mxu0 %vm401_vm1, %v3794_v35  ;;  %3057 = vmatpush.msk.msrb.mxu1 %vm401_vm1, %v2371_v37  ;;  %v3211_v35 = vunpack.i.h.bf16 %v3936_v27  ;;  %v2463_v61 = vsel %vm905_vm7, %v3216_v59, %v2460_v54  ;;  %v2465_v17 = vsel %vm905_vm7, %v3215_v4, %v3216_v59  ;;  %v2467_v21 = vsel %vm905_vm7, %v2460_v54, %v3215_v4 }
 0x34a   : > { %2348 = vmatpush.msrb.mxu0 %v3621_v13  ;;  %2403 = vmatpush.msrb.mxu1 %v2370_v56  ;;  %v2560_v0 = vsel %vm992_vm8, %v3210_v49, %v3211_v35 }
 0x34b   : > { %3046 = vmatmul.msk.f32.vlgmr.msra.gmra.mxu0 %vm1918_vm11, %v3042_v41  ;;  %3048 = vmatmul.msk.f32.vlgmr.msra.gmra.mxu1 %vm1918_vm11, %v3042_v41  ;;  %v2555_v3 = vpop.permute.xlu2 %2554 }
 0x34c   : > { %3051 = vmatmul.msk.f32.vlgmr.msra.gmra.mxu2 %vm1918_vm11, %v3049_v57  ;;  %3053 = vmatmul.msk.f32.vlgmr.msra.gmra.mxu3 %vm1918_vm11, %v3049_v57  ;;  %v2562_v8 = vsel %vm992_vm8, %v2555_v3, %v3210_v49 }
 0x34d   : > { %3066 = vmatpush.msk.msra.mxu1 %vm401_vm1, %v2464_v60  ;;  %v2549_v13 = vpop.permute.xlu1 %2548  ;;  %v2557_v63 = vpop.permute.xlu0 %2556 }
 0x34e   : > { %v2561_v62 = vsel %vm992_vm8, %v2549_v13, %v3899_v2  ;;  %v2563_v5 = vsel %vm992_vm8, %v2557_v63, %v2549_v13  ;;  %v2559_v19 = vsel %vm992_vm8, %v3899_v2, %v2557_v63 }
 0x34f   : > { %2518 = vmatpush.msra.mxu1 %v2463_v61  ;;  %3071 = vmatpush.msk.msra.mxu3 %vm401_vm1, %v2561_v62 }
 0x351   : > { %2593 = vmatpush.msra.mxu3 %v2560_v0 }
 0x353   : > { %3055 = vmatmul.msk.f32.vlgmr.msrb.gmra.mxu0 %vm1918_vm11, %v3049_v57  ;;  %3058 = vmatmul.msk.f32.vlgmr.msrb.gmra.mxu1 %vm1918_vm11, %v3056_v1  ;;  %v1897_v48 = vpop.permute.xlu2 %1896 }
 0x354   : > { %3060 = vmatmul.msk.f32.vlgmr.msrb.gmra.mxu2 %vm1918_vm11, %v3056_v1  ;;  %3062 = vmatmul.msk.f32.vlgmr.msrb.gmra.mxu3 %vm1918_vm11, %v3056_v1 }
 0x355   : > { %3075 = vmatpush.msk.msrb.mxu1 %vm401_vm1, %v2563_v5  ;;  %v2454_v7 = vpop.permute.xlu1 %2453  ;;  %v2644_v20 = vpop.permute.xlu0 %2643 }
 0x356   : > { %v2466_v9 = vsel %vm905_vm7, %v2454_v7, %v3926_v23  ;;  %v2468_v14 = vsel %vm905_vm7, %v3963_v36, %v2454_v7  ;;  %v2656_v2 = vsel %vm1079_vm9, %v2644_v20, %v4008_v15  ;;  %v2558_v23 = vsel %vm992_vm8, %v3211_v35, %v2555_v3 }
 0x357   : > { %2633 = vmatpush.msrb.mxu1 %v2562_v8  ;;  %3064 = vmatpush.msk.msra.mxu0 %vm401_vm1, %v2466_v9 }
 0x358   : > { %3068 = vmatpush.msk.msra.mxu2 %vm401_vm1, %v2468_v14 }
 0x359   : > { %2498 = vmatpush.msra.mxu0 %v2465_v17 }
 0x35a   : > { %2538 = vmatpush.msra.mxu2 %v2467_v21 }
 0x35b   : > { %3073 = vmatpush.msk.msrb.mxu0 %vm401_vm1, %v2559_v19  ;;  %3067 = vmatmul.msk.f32.vlgmr.msra.gmra.mxu1 %vm1918_vm11, %v3063_v18 }
 0x35c   : > { %3065 = vmatmul.msk.f32.vlgmr.msra.gmra.mxu0 %vm1918_vm11, %v3063_v18  ;;  %3069 = vmatmul.msk.f32.vlgmr.msra.gmra.mxu2 %vm1918_vm11, %v3063_v18 }
 0x35d   : > { %3072 = vmatmul.msk.f32.vlgmr.msra.gmra.mxu3 %vm1918_vm11, %v3070_v22  ;;  %3078 = vmatpush.msk.msrb.mxu2 %vm401_vm1, %v2656_v2  ;;  %v2652_v24 = vpop.permute.xlu1 %2651 }
 0x35e   : > { %2613 = vmatpush.msrb.mxu0 %v2558_v23  ;;  %v2654_v25 = vsel %vm1079_vm9, %v4008_v15, %v2652_v24  ;;  %v2658_v26 = vsel %vm1079_vm9, %v2652_v24, %v2644_v20 }
 0x35f   : > { %3080 = vmatpush.msk.msrb.mxu3 %vm401_vm1, %v2654_v25 }
 0x360   : > { %3082 = vmatpush.msk.msra.mxu0 %vm401_vm1, %v2658_v26 }
 0x363   : > { %3076 = vmatmul.msk.f32.vlgmr.msrb.gmra.mxu1 %vm1918_vm11, %v3070_v22 }
 0x364   : > { %3074 = vmatmul.msk.f32.vlgmr.msrb.gmra.mxu0 %vm1918_vm11, %v3070_v22 }
 0x365   : > { %v3219_v27 = vpop.permute.xlu1 %3218 }
 0x366   : > { %v3221_v28 = vunpack.i.h.bf16 %v3219_v27  ;;  %v3220_v29 = vunpack.i.l.bf16 %v3219_v27 }
 0x368   : > { %v2653_v31 = vsel %vm1079_vm9, %v3220_v29, %v3221_v28 }
 0x369   : > { %2708 = vmatpush.msrb.mxu3 %v2653_v31 }
 0x36a   : > { %3081 = vmatmul.msk.f32.vlgmr.msrb.gmra.mxu3 %vm1918_vm11, %v3077_v30 }
 0x36d   : > { %v2642_v32 = vpop.permute.xlu1 %2641 }
 0x36e   : > { %v2655_v33 = vsel %vm1079_vm9, %v2642_v32, %v3220_v29  ;;  %v2657_v16 = vsel %vm1079_vm9, %v3221_v28, %v2642_v32 }
 0x36f   : > { %2688 = vmatpush.msrb.mxu2 %v2655_v33  ;;  %2728 = vmatpush.msra.mxu0 %v2657_v16 }
 0x370   : > { %3079 = vmatmul.msk.f32.vlgmr.msrb.gmra.mxu2 %vm1918_vm11, %v3077_v30  ;;  %3083 = vmatmul.msk.f32.vlgmr.msra.gmra.mxu0 %vm1918_vm11, %v3077_v30 }
 0x39f   : > { %v1988_v38 = vpop.f32.mrf.mxu0 }
 0x3a0   : > { %v1993_v50 = vadd.f32 %v1988_v38, %v1897_v48 }
 0x3a7   : > { %v2043_v11 = vpop.f32.mrf.mxu1 }
 0x3b5   : > { %v1948_v39 = vpop.f32.mrf.mxu2  ;;  %v1968_v36 = vpop.f32.mrf.mxu3 }
 0x3b6   : > { %v1992_v51 = vadd.f32 %v1968_v36, %v1897_v48  ;;  %v1991_v52 = vadd.f32 %v1948_v39, %v1897_v48  ;;  %v2831_v48 = vld [vmem:[#allocation2 + $0x28] sm:$0xf] }
 0x3b8   : > { %v2086_v59 = vadd.f32 %v2043_v11, %v1991_v52 }
 0x3bd   : > { %v2063_v12 = vpop.f32.mrf.mxu2  ;;  %v2083_v34 = vpop.f32.mrf.mxu3 }
 0x3be   : > { %v2088_v53 = vadd.f32 %v2083_v34, %v1993_v50  ;;  %v2087_v57 = vadd.f32 %v2063_v12, %v1992_v51  ;;  %v2757_v34 = vld [vmem:[#allocation2 + $0x8] sm:$0xff] }
 0x3bf   : > { %v2138_v41 = vpop.f32.mrf.mxu0  ;;  %v2158_v42 = vpop.f32.mrf.mxu1 }
 0x3c0   : > { %v2182_v60 = vadd.f32 %v2158_v42, %v2087_v57  ;;  %v2181_v13 = vadd.f32 %v2138_v41, %v2086_v59  ;;  %v2755_v41 = vld [vmem:[#allocation2 + $0x28] sm:$0xff]  ;;  %v2765_v42 = vpop.permute.xlu0 %2764 }
 0x3c6   : > { %v2178_v43 = vpop.f32.mrf.mxu2  ;;  %v2233_v45 = vpop.f32.mrf.mxu3 }
 0x3c7   : > { %v2183_v35 = vadd.f32 %v2178_v43, %v2088_v53  ;;  %v2276_v5 = vadd.f32 %v2233_v45, %v2181_v13 }
 0x3c8   : > { %v2253_v44 = vpop.f32.mrf.mxu0  ;;  %v2273_v40 = vpop.f32.mrf.mxu1 }
 0x3c9   : > { %v2277_v61 = vadd.f32 %v2253_v44, %v2182_v60  ;;  %v2278_v62 = vadd.f32 %v2273_v40, %v2183_v35  ;;  %v2832_v44 = vld [vmem:[#allocation2 + $0x10] sm:$0xf] }
 0x3cf   : > { %v2310_v10 = vpop.f32.mrf.mxu2  ;;  %v2330_v46 = vpop.f32.mrf.mxu3 }
 0x3d0   : > { %v2350_v47 = vpop.f32.mrf.mxu0  ;;  %v2405_v15 = vpop.f32.mrf.mxu1  ;;  %v2354_v63 = vadd.f32 %v2330_v46, %v2277_v61  ;;  %v2353_v17 = vadd.f32 %v2310_v10, %v2276_v5 }
 0x3d1   : > { %v2355_v0 = vadd.f32 %v2350_v47, %v2278_v62  ;;  %v2833_v47 = vld [vmem:[#allocation2 + $0x8] sm:$0xf] }
 0x3d2   : > { %v2448_v2 = vadd.f32 %v2405_v15, %v2353_v17 }
 0x3d7   : > { %v2425_v37 = vpop.f32.mrf.mxu2  ;;  %v2445_v54 = vpop.f32.mrf.mxu3 }
 0x3d8   : > { %v2520_v49 = vpop.f32.mrf.mxu1  ;;  %v2449_v7 = vadd.f32 %v2425_v37, %v2354_v63  ;;  %v2450_v8 = vadd.f32 %v2445_v54, %v2355_v0 }
 0x3d9   : > { %v2500_v56 = vpop.f32.mrf.mxu0 }
 0x3da   : > { %v2544_v18 = vadd.f32 %v2520_v49, %v2449_v7  ;;  %v2543_v25 = vadd.f32 %v2500_v56, %v2448_v2 }
 0x3df   : > { %v2540_v1 = vpop.f32.mrf.mxu2 }
 0x3e0   : > { %v2595_v3 = vpop.f32.mrf.mxu3  ;;  %v2545_v9 = vadd.f32 %v2540_v1, %v2450_v8  ;;  %v2635_v14 = vpop.f32.mrf.mxu1 }
 0x3e1   : > { %v2615_v4 = vpop.f32.mrf.mxu0  ;;  %v2638_v28 = vadd.f32 %v2595_v3, %v2543_v25 }
 0x3e2   : > { %v2639_v19 = vadd.f32 %v2615_v4, %v2544_v18  ;;  %v2640_v20 = vadd.f32 %v2635_v14, %v2545_v9 }
 0x3ed   : > { %v2710_v21 = vpop.f32.mrf.mxu3  ;;  %v2730_v22 = vpop.f32.mrf.mxu0 }
 0x3ee   : > { %v2734_v23 = vadd.f32 %v2710_v21, %v2639_v19  ;;  %v2735_v24 = vadd.f32 %v2730_v22, %v2640_v20 }
 0x3f0   : > { %v2737_v26 = vmax.f32 %v2734_v23, 0.0  ;;  %v2738_v27 = vmax.f32 %v2735_v24, 0.0 }
 0x3f2   : > { %v2740_v29 = vmul.f32 %v2737_v26, %v3608_v58  ;;  %v2741_v30 = vmul.f32 %v2738_v27, %v3612_v6  ;;  %v2754_v58 = vld [vmem:[%s4162_s8] sm:$0xf]  ;;  %v2756_v6 = vld [vmem:[#allocation2 + $0x10] sm:$0xff] }
 0x3f3   : > { %v2690_v31 = vpop.f32.mrf.mxu2 }
 0x3f4   : > { %v2746_v32 = vrot.slane %v2740_v29, 4  ;;  %v2747_v33 = vrot.slane %v2741_v30, 4  ;;  %v2733_v16 = vadd.f32 %v2690_v31, %v2638_v28 }
 0x3f6   : > { %2752 = vst [vmem:[#allocation2 + $0x18] sm:$0xf0] %v2746_v32  ;;  %v2736_v38 = vmax.f32 %v2733_v16, 0.0 }
 0x3f7   : > { %2753 = vst [vmem:[#allocation2 + $0x20] sm:$0xf0] %v2747_v33 }
 0x3f8   : > { %v2739_v39 = vmul.f32 %v2736_v38, %v3606_v55 }
 0x3fa   : > { %v2745_v36 = vrot.slane %v2739_v39, 4 }
 0x3fc   : > { %2751 = vst [vmem:[#allocation2] sm:$0xf0] %v2745_v36 }
 0x3fd   : > { %v2759_v11 = vld [vmem:[#allocation2 + $0x18] sm:$0xff] }
 0x3fe   : > { %2805 = vmatpush.msra.mxu2 %v2759_v11  ;;  %v2760_v12 = vld [vmem:[#allocation2 + $0x20] sm:$0xff] }
 0x3ff   : > { %2825 = vmatpush.msra.mxu3 %v2760_v12 }
 0x400   : > { %2806 = vmatpush.msra.mxu2 %v2756_v6 }
 0x401   : > { %2826 = vmatpush.msra.mxu3 %v2757_v34  ;;  %3085 = vmatmul.msk.f32.vlgmr.msra.gmra.mxu2 %vm2767_vm12, %v2754_v58 }
 0x402   : > { %3086 = vmatmul.msk.f32.vlgmr.msra.gmra.mxu3 %vm2767_vm12, %v2754_v58 }
 0x403   : > { %v2758_v55 = vld [vmem:[#allocation2] sm:$0xff] }
 0x404   : > { %2785 = vmatpush.msra.mxu1 %v2758_v55 }
 0x406   : > { %2786 = vmatpush.msra.mxu1 %v2755_v41 }
 0x407   : > { %3084 = vmatmul.msk.f32.vlgmr.msra.gmra.mxu1 %vm2767_vm12, %v2754_v58 }
 0x484   : > { %v2788_v43 = vpop.f32.mrf.mxu1  ;;  %v2808_v45 = vpop.f32.mrf.mxu2 }
 0x485   : > { %v2789_v40 = vadd.f32 %v2788_v43, %v2765_v42  ;;  %v2809_v10 = vadd.f32 %v2808_v45, %v2765_v42  ;;  %v2828_v46 = vpop.f32.mrf.mxu3 }
 0x486   : > { %v2829_v15 = vadd.f32 %v2828_v46, %v2765_v42 }
 0x487   : > { %v2835_v50 = vadd.f32 %v2832_v44, %v2809_v10  ;;  %v2834_v52 = vadd.f32 %v2831_v48, %v2789_v40 }
 0x488   : > { %v2836_v51 = vadd.f32 %v2833_v47, %v2829_v15 }
 0x489   : > { %v2839_v53 = vrot.slane %v2835_v50, 4 }
 0x48a   : > { %2843 = vst [vmem:[%s352_s27 + $0x8] sm:$0xf] %v2836_v51 }
 0x48b   : > { %v2840_v37 = vsel %vm401_vm1, %v2834_v52, %v2839_v53 }
 0x48c   : > { %2842 = vst [vmem:[%s352_s27] sm:$0xff] %v2840_v37 }
 0x48d   : > { %3250 = shalt.err (!%p3247_p3)
}
 0x48e   : > { %3093 = dma.vmem_to_hbm [thread:$0]  (%p3389_p5), %s2859_s29, 192, %s2861_s17, %s2845_s30  }
 0x48f PF: > { %p3099_p4 = scmp.ge.s32.totalorder %s3285_s16, 2  ;;  %s2872_s18 = sand.u32 1, %s3273_s13  }
 0x490   : > { %s2873_s27 = scalar_lea.sflag [#allocation4], %s2872_s18 }
 0x491   : > { %p3096_p7 = pnand %p3099_p4, %p3393_p6 }
 0x493   : > { %p3097_p8 = pneg %p3096_p7 }
 0x495   : > { %3268 = dma.done.wait (%p3097_p8), %s2873_s27, 192  }
 0x496   : > { %3270 = vsyncadd (%p3097_p8), %s2873_s27, 4294967104  ;;  %p20_p9 = scmp.ge.s32.totalorder %s3376_s19, 4   ;;  %s4173_s13 = smov %s3277_s14 }
 0x497   : > { %s4174_s14 = smov %s3281_s15  ;;  %s4175_s15 = smov %s3387_s22 }
 0x498   : > { %s4176_s16 = smov %s3376_s19  ;;  %22 = sbr.rel (!%p20_p9) target bundleno = 3 (0x3), region = 120 }
 0x49d   :  { %2879 = vsyncpa [#allocation4], 1 }
 0x49e   :  { %2881 = vsyncpa [#allocation4 + $0x1], 1 }

</bundles_post_ra>
